<compile_context>
chip_gen: v7x
topology: tpu7x:2x2x1
jax: 0.10.0
libtpu: 0.0.40
codegen_flags: <defaults>
</compile_context>

<pallas_src>
import functools

import jax
import jax.numpy as jnp
from jax.experimental import pallas as pl
from jax.experimental.pallas import tpu as pltpu

VMEM = pltpu.MemorySpace.VMEM
HP = 128  # padded hidden / lane width


# ----------------------------- Pallas kernels -----------------------------

def _fused_layers_kernel(node_ref, edge_ref, src_oh_ref, dst_oh_ref,
                         dst_oh_t_ref,
                         ehw_ref, ehb_ref, eew_ref, eeb_ref,
                         w4_ref, b4_ref, wc_ref, bc_ref,
                         gh_ref, bth_ref, ge_ref, bte_ref,
                         h_out_ref, h_scr, e_scr, *, hp):
    """Embedding (layer 0 only) + one GatedGCN layer per grid step.

    GatedGCN layer (Dwivedi & Bresson benchmark layer):
        e_ij  = D h_src + E h_dst + C e
        sigma = sigmoid(e_ij)
        h_i   = A h_i + sum_j(sigma_ij * B h_j) / (sum_j sigma_ij + 1e-6)
        BatchNorm (batch stats) -> ReLU -> residual; dropout p=0 (identity).
    """
    l = pl.program_id(0)
    dot = lambda a, b: jnp.dot(a, b, preferred_element_type=jnp.float32)

    @pl.when(l == 0)
    def _init():
        # node embedding: [N, HP] @ [HP, HP]  (input_dim zero-padded)
        h_scr[...] = dot(node_ref[...], ehw_ref[...]) + ehb_ref[...]
        # edge embedding: in_dim_edge == 1 -> broadcast outer product
        e_scr[...] = edge_ref[...] * eew_ref[...] + eeb_ref[...]

    h = h_scr[...]                        # [N, HP]
    e = e_scr[...]                        # [E, HP]

    # fused [D | B | A | E] projection of h, and C projection of e
    proj = dot(h, w4_ref[...]) + b4_ref[...]          # [N, 4*HP]
    Ah = proj[:, 2 * hp:3 * hp]
    Eh = proj[:, 3 * hp:4 * hp]
    Ce = dot(e, wc_ref[...]) + bc_ref[...]            # [E, HP]

    # fused gather of (Dh, Bh) at edge sources; Eh at edge destinations
    DB_src = dot(src_oh_ref[...], proj[:, 0:2 * hp])  # [E, 2*HP]
    Dh_src = DB_src[:, 0:hp]
    Bh_src = DB_src[:, hp:2 * hp]
    Eh_dst = dot(dst_oh_ref[...], Eh)                 # [E, HP]

    e_new = Dh_src + Eh_dst + Ce                      # [E, HP]
    sigma = jax.nn.sigmoid(e_new)

    # fused scatter-add of (sigma * Bh_src, sigma) onto destination nodes
    msg = jnp.concatenate([sigma * Bh_src, sigma], axis=1)   # [E, 2*HP]
    agg = dot(dst_oh_t_ref[...], msg)                        # [N, 2*HP]
    h_new = Ah + agg[:, 0:hp] / (agg[:, hp:2 * hp] + 1e-6)

    # BatchNorm1d, training-mode batch statistics, eps=1e-5, biased variance.
    def bn(x, gamma, beta):
        mu = jnp.mean(x, axis=0, keepdims=True)
        xc = x - mu
        var = jnp.mean(xc * xc, axis=0, keepdims=True)
        return xc * jax.lax.rsqrt(var + 1e-5) * gamma + beta

    h_new = jnp.maximum(bn(h_new, gh_ref[...], bth_ref[...]), 0.0)
    e_new = jnp.maximum(bn(e_new, ge_ref[...], bte_ref[...]), 0.0)

    # residual (dropout p = 0.0 -> identity)
    h_scr[...] = h + h_new
    e_scr[...] = e + e_new

    @pl.when(l == pl.num_programs(0) - 1)
    def _finalize():
        h_out_ref[...] = h_scr[...]


def _readout_kernel(h_ref, w0_ref, b0_ref, w1_ref, b1_ref, w2_ref, b2_ref,
                    o_ref):
    # MLPReadout: H -> H/2 -> H/4 -> n_classes (all padded to 128 lanes),
    # then torch.nn.functional.normalize(x, dim=1).
    dot = lambda a, b: jnp.dot(a, b, preferred_element_type=jnp.float32)
    y = jnp.maximum(dot(h_ref[...], w0_ref[...]) + b0_ref[...], 0.0)
    y = jnp.maximum(dot(y, w1_ref[...]) + b1_ref[...], 0.0)
    y = dot(y, w2_ref[...]) + b2_ref[...]
    n = jnp.sqrt(jnp.sum(y * y, axis=1, keepdims=True))
    o_ref[...] = y / jnp.maximum(n, 1e-12)


# ----------------------------- wrappers -----------------------------

def gated_layers_fused(node_p, edge_h, src_oh, dst_oh, dst_oh_t, pk):
    N = node_p.shape[0]
    E = edge_h.shape[0]
    L = pk["w4"].shape[0]
    hp = pk["w4"].shape[1]

    const2 = lambda shape: pl.BlockSpec(shape, lambda l: (0, 0))
    per_layer = lambda s1, s2: pl.BlockSpec((None, s1, s2),
                                            lambda l: (l, 0, 0))

    grid_spec = pltpu.PrefetchScalarGridSpec(
        num_scalar_prefetch=0,
        grid=(L,),
        in_specs=[
            const2((N, hp)),          # node features (padded)
            const2((E, 1)),           # edge features
            const2((E, N)),           # one-hot(src)
            const2((E, N)),           # one-hot(dst)
            const2((N, E)),           # one-hot(dst)^T (kept: DMA'd once)
            const2((hp, hp)),         # emb_h_w
            const2((1, hp)),          # emb_h_b
            const2((1, hp)),          # emb_e_w
            const2((1, hp)),          # emb_e_b
            per_layer(hp, 4 * hp),    # W [D|B|A|E]
            per_layer(1, 4 * hp),     # b [D|B|A|E]
            per_layer(hp, hp),        # W_C
            per_layer(1, hp),         # b_C
            per_layer(1, hp),         # BN_h gamma
            per_layer(1, hp),         # BN_h beta
            per_layer(1, hp),         # BN_e gamma
            per_layer(1, hp),         # BN_e beta
        ],
        out_specs=pl.BlockSpec((N, hp), lambda l: (0, 0)),
        scratch_shapes=[pltpu.VMEM((N, hp), jnp.float32),   # h carry
                        pltpu.VMEM((E, hp), jnp.float32)],  # e carry
    )
    return pl.pallas_call(
        functools.partial(_fused_layers_kernel, hp=hp),
        out_shape=jax.ShapeDtypeStruct((N, hp), jnp.float32),
        grid_spec=grid_spec,
        compiler_params=pltpu.CompilerParams(
            dimension_semantics=("arbitrary",)),
    )(node_p, edge_h, src_oh, dst_oh, dst_oh_t,
      pk["emb_h_w"], pk["emb_h_b"], pk["emb_e_w"], pk["emb_e_b"],
      pk["w4"], pk["b4"], pk["wc"], pk["bc"],
      pk["bn_h_g"], pk["bn_h_b"], pk["bn_e_g"], pk["bn_e_b"])


def readout(h, pk):
    N, hp = h.shape
    return pl.pallas_call(
        _readout_kernel,
        out_shape=jax.ShapeDtypeStruct((N, hp), jnp.float32),
        in_specs=[pl.BlockSpec(memory_space=VMEM)] * 7,
        out_specs=pl.BlockSpec(memory_space=VMEM),
    )(h, pk["mlp_w0"], pk["mlp_b0"], pk["mlp_w1"], pk["mlp_b1"],
      pk["mlp_w2"], pk["mlp_b2"])


# ----------------------------- parameters -----------------------------

def init_params(key, input_dim=9, in_dim_edge=1, hidden_dim=80, n_layers=10,
                n_classes=4):
    """True-shape (un-padded) parameters, matching the PyTorch module dims."""
    def dense(k, fan_in, fan_out):
        kw, _ = jax.random.split(k)
        w = jax.random.normal(kw, (fan_in, fan_out), jnp.float32) * 0.1
        b = jnp.zeros((1, fan_out), jnp.float32)
        return w, b

    keys = jax.random.split(key, 6 + 5 * n_layers)
    ki = iter(keys)

    params = {}
    params["emb_h_w"], params["emb_h_b"] = dense(next(ki), input_dim, hidden_dim)
    params["emb_e_w"], params["emb_e_b"] = dense(next(ki), in_dim_edge, hidden_dim)

    layers = {k: [] for k in ["wa", "ba", "wb", "bb", "wd", "bd", "we", "be",
                              "wc", "bc", "bn_h_g", "bn_h_b", "bn_e_g", "bn_e_b"]}
    for _ in range(n_layers):
        for wn, bn_ in (("wa", "ba"), ("wb", "bb"), ("wd", "bd"),
                        ("we", "be"), ("wc", "bc")):
            w, b = dense(next(ki), hidden_dim, hidden_dim)
            layers[wn].append(w)
            layers[bn_].append(b)
        layers["bn_h_g"].append(jnp.ones((1, hidden_dim), jnp.float32))
        layers["bn_h_b"].append(jnp.zeros((1, hidden_dim), jnp.float32))
        layers["bn_e_g"].append(jnp.ones((1, hidden_dim), jnp.float32))
        layers["bn_e_b"].append(jnp.zeros((1, hidden_dim), jnp.float32))
    params["layers"] = {k: jnp.stack(v) for k, v in layers.items()}

    # MLPReadout(hidden_dim, n_classes, L=2): H -> H/2 -> H/4 -> n_classes
    d0, d1, d2 = hidden_dim, hidden_dim // 2, hidden_dim // 4
    params["mlp_w0"], params["mlp_b0"] = dense(next(ki), d0, d1)
    params["mlp_w1"], params["mlp_b1"] = dense(next(ki), d1, d2)
    params["mlp_w2"], params["mlp_b2"] = dense(next(ki), d2, n_classes)
    return params


def pack_params(p, hp=HP):
    """Zero-pad all feature dims to `hp` lanes and fuse A/B/D/E into [H,4H]."""
    lay = p["layers"]

    def pad_w(w):   # pad last two dims to (hp, hp)
        pads = [(0, 0)] * (w.ndim - 2) + [(0, hp - w.shape[-2]),
                                          (0, hp - w.shape[-1])]
        return jnp.pad(w, pads)

    def pad_b(b):   # pad last dim to hp
        pads = [(0, 0)] * (b.ndim - 1) + [(0, hp - b.shape[-1])]
        return jnp.pad(b, pads)

    pk = {}
    pk["emb_h_w"] = pad_w(p["emb_h_w"])      # [in_dim, H] -> [hp, hp]
    pk["emb_h_b"] = pad_b(p["emb_h_b"])
    pk["emb_e_w"] = pad_b(p["emb_e_w"])      # [1, H] -> [1, hp]
    pk["emb_e_b"] = pad_b(p["emb_e_b"])
    # fused projection, output column order [D | B | A | E]
    pk["w4"] = jnp.concatenate([pad_w(lay["wd"]), pad_w(lay["wb"]),
                                pad_w(lay["wa"]), pad_w(lay["we"])], axis=-1)
    pk["b4"] = jnp.concatenate([pad_b(lay["bd"]), pad_b(lay["bb"]),
                                pad_b(lay["ba"]), pad_b(lay["be"])], axis=-1)
    pk["wc"] = pad_w(lay["wc"])
    pk["bc"] = pad_b(lay["bc"])
    for k in ("bn_h_g", "bn_h_b", "bn_e_g", "bn_e_b"):
        pk[k] = pad_b(lay[k])
    pk["mlp_w0"] = pad_w(p["mlp_w0"])
    pk["mlp_b0"] = pad_b(p["mlp_b0"])
    pk["mlp_w1"] = pad_w(p["mlp_w1"])
    pk["mlp_b1"] = pad_b(p["mlp_b1"])
    pk["mlp_w2"] = pad_w(p["mlp_w2"])
    pk["mlp_b2"] = pad_b(p["mlp_b2"])
    return pk


# ----------------------------- forward -----------------------------

@functools.partial(jax.jit, static_argnames=("n_classes",))
def gated_gcn_forward(node_h, edge_h, src, dst, packed, n_classes=4):
    N = node_h.shape[0]
    hp = packed["wc"].shape[-1]
    node_p = jnp.pad(node_h, ((0, 0), (0, hp - node_h.shape[1])))
    src_oh = jax.nn.one_hot(src, N, dtype=jnp.float32)    # [E, N]
    dst_oh = jax.nn.one_hot(dst, N, dtype=jnp.float32)    # [E, N]
    dst_oh_t = dst_oh.T                                    # [N, E]

    # TODO(synk): pos_enc branch disabled in the module (self.pos_enc = False).
    h = gated_layers_fused(node_p, edge_h, src_oh, dst_oh, dst_oh_t, packed)
    y = readout(h, packed)                                 # [N, hp]
    return y[:, :n_classes]                                # drop padded lanes


if __name__ == "__main__":
    key = jax.random.PRNGKey(0)
    k_param, k_h, k_e, k_s, k_d = jax.random.split(key, 5)

    N, E = 16, 32                       # nodes, edges (small synthetic graph)
    INPUT_DIM, EDGE_DIM = 9, 1
    HIDDEN, N_LAYERS, N_CLASSES = 80, 10, 4

    params = init_params(k_param, INPUT_DIM, EDGE_DIM, HIDDEN, N_LAYERS,
                         N_CLASSES)
    packed = pack_params(params, hp=HP)

    node_h = jax.random.normal(k_h, (N, INPUT_DIM), jnp.float32)
    edge_h = jax.random.normal(k_e, (E, EDGE_DIM), jnp.float32)
    src = jax.random.randint(k_s, (E,), 0, N, jnp.int32)
    dst = jax.random.randint(k_d, (E,), 0, N, jnp.int32)

    out = gated_gcn_forward(node_h, edge_h, src, dst, packed,
                            n_classes=N_CLASSES)
    out = jax.block_until_ready(out)
    assert out.shape == (N, N_CLASSES)
    assert bool(jnp.all(jnp.isfinite(out)))
    print("KERNEL_OK")
</pallas_src>

<mosaic_0001>
module attributes {stable_mosaic.version = 11 : i64} {
  func.func @_readout_kernel(%arg0: memref<16x128xf32, #tpu.memory_space<vmem>>, %arg1: memref<128x128xf32, #tpu.memory_space<vmem>>, %arg2: memref<1x128xf32, #tpu.memory_space<vmem>>, %arg3: memref<128x128xf32, #tpu.memory_space<vmem>>, %arg4: memref<1x128xf32, #tpu.memory_space<vmem>>, %arg5: memref<128x128xf32, #tpu.memory_space<vmem>>, %arg6: memref<1x128xf32, #tpu.memory_space<vmem>>, %arg7: memref<16x128xf32, #tpu.memory_space<vmem>>) attributes {dimension_semantics = [], scalar_prefetch = 0 : i64, scratch_operands = 0 : i64, tpu.core_type = #tpu.core_type<tc>} {
    %c0 = arith.constant 0 : index
    %c0_0 = arith.constant 0 : index
    %0 = vector.load %arg0[%c0, %c0_0] : memref<16x128xf32, #tpu.memory_space<vmem>>, vector<16x128xf32>
    %c0_1 = arith.constant 0 : index
    %c0_2 = arith.constant 0 : index
    %1 = vector.load %arg1[%c0_1, %c0_2] : memref<128x128xf32, #tpu.memory_space<vmem>>, vector<128x128xf32>
    %cst = arith.constant dense<0.000000e+00> : vector<16x128xf32>
    %2 = tpu.matmul %0, %1, %cst {dimension_numbers = #tpu.dot_dimension_numbers<[1], [0], [0], [1], [0, 0, 1, 1], [], []>} : vector<16x128xf32>, vector<128x128xf32>, vector<16x128xf32> -> vector<16x128xf32>
    %c0_3 = arith.constant 0 : index
    %c0_4 = arith.constant 0 : index
    %3 = vector.load %arg2[%c0_3, %c0_4] : memref<1x128xf32, #tpu.memory_space<vmem>>, vector<1x128xf32>
    %4 = vector.broadcast %3 : vector<1x128xf32> to vector<16x128xf32>
    %5 = arith.addf %2, %4 : vector<16x128xf32>
    %cst_5 = arith.constant 0.000000e+00 : f32
    %6 = vector.broadcast %cst_5 : f32 to vector<16x128xf32>
    %7 = arith.maximumf %5, %6 : vector<16x128xf32>
    %c0_6 = arith.constant 0 : index
    %c0_7 = arith.constant 0 : index
    %8 = vector.load %arg3[%c0_6, %c0_7] : memref<128x128xf32, #tpu.memory_space<vmem>>, vector<128x128xf32>
    %cst_8 = arith.constant dense<0.000000e+00> : vector<16x128xf32>
    %9 = tpu.matmul %7, %8, %cst_8 {dimension_numbers = #tpu.dot_dimension_numbers<[1], [0], [0], [1], [0, 0, 1, 1], [], []>} : vector<16x128xf32>, vector<128x128xf32>, vector<16x128xf32> -> vector<16x128xf32>
    %c0_9 = arith.constant 0 : index
    %c0_10 = arith.constant 0 : index
    %10 = vector.load %arg4[%c0_9, %c0_10] : memref<1x128xf32, #tpu.memory_space<vmem>>, vector<1x128xf32>
    %11 = vector.broadcast %10 : vector<1x128xf32> to vector<16x128xf32>
    %12 = arith.addf %9, %11 : vector<16x128xf32>
    %cst_11 = arith.constant 0.000000e+00 : f32
    %13 = vector.broadcast %cst_11 : f32 to vector<16x128xf32>
    %14 = arith.maximumf %12, %13 : vector<16x128xf32>
    %c0_12 = arith.constant 0 : index
    %c0_13 = arith.constant 0 : index
    %15 = vector.load %arg5[%c0_12, %c0_13] : memref<128x128xf32, #tpu.memory_space<vmem>>, vector<128x128xf32>
    %cst_14 = arith.constant dense<0.000000e+00> : vector<16x128xf32>
    %16 = tpu.matmul %14, %15, %cst_14 {dimension_numbers = #tpu.dot_dimension_numbers<[1], [0], [0], [1], [0, 0, 1, 1], [], []>} : vector<16x128xf32>, vector<128x128xf32>, vector<16x128xf32> -> vector<16x128xf32>
    %c0_15 = arith.constant 0 : index
    %c0_16 = arith.constant 0 : index
    %17 = vector.load %arg6[%c0_15, %c0_16] : memref<1x128xf32, #tpu.memory_space<vmem>>, vector<1x128xf32>
    %18 = vector.broadcast %17 : vector<1x128xf32> to vector<16x128xf32>
    %19 = arith.addf %16, %18 : vector<16x128xf32>
    %20 = arith.mulf %19, %19 : vector<16x128xf32>
    %cst_17 = arith.constant dense<0.000000e+00> : vector<16xf32>
    %21 = vector.multi_reduction <add>, %20, %cst_17 [1] : vector<16x128xf32> to vector<16xf32>
    %22 = vector.shape_cast %21 : vector<16xf32> to vector<16x1xf32>
    %23 = math.sqrt %22 : vector<16x1xf32>
    %cst_18 = arith.constant 9.99999996E-13 : f32
    %24 = vector.broadcast %cst_18 : f32 to vector<16x1xf32>
    %25 = arith.maximumf %23, %24 : vector<16x1xf32>
    %26 = vector.broadcast %25 : vector<16x1xf32> to vector<16x128xf32>
    %27 = arith.divf %19, %26 : vector<16x128xf32>
    %c0_19 = arith.constant 0 : index
    %c0_20 = arith.constant 0 : index
    %28 = vector.load %arg7[%c0_19, %c0_20] : memref<16x128xf32, #tpu.memory_space<vmem>>, vector<16x128xf32>
    tpu.vector_store %arg7[%c0_19, %c0_20], %27 {strides = array<i32>} : memref<16x128xf32, #tpu.memory_space<vmem>>, vector<16x128xf32>,
    return
  }
}

module attributes {stable_mosaic.version = 11 : i64} {
  func.func @_fused_layers_kernel(%arg0: i32, %arg1: memref<16x128xf32, #tpu.memory_space<vmem>>, %arg2: memref<32x1xf32, #tpu.memory_space<vmem>>, %arg3: memref<32x16xf32, #tpu.memory_space<vmem>>, %arg4: memref<32x16xf32, #tpu.memory_space<vmem>>, %arg5: memref<16x32xf32, #tpu.memory_space<vmem>>, %arg6: memref<128x128xf32, #tpu.memory_space<vmem>>, %arg7: memref<1x128xf32, #tpu.memory_space<vmem>>, %arg8: memref<1x128xf32, #tpu.memory_space<vmem>>, %arg9: memref<1x128xf32, #tpu.memory_space<vmem>>, %arg10: memref<1x128x512xf32, #tpu.memory_space<vmem>>, %arg11: memref<1x1x512xf32, #tpu.memory_space<vmem>>, %arg12: memref<1x128x128xf32, #tpu.memory_space<vmem>>, %arg13: memref<1x1x128xf32, #tpu.memory_space<vmem>>, %arg14: memref<1x1x128xf32, #tpu.memory_space<vmem>>, %arg15: memref<1x1x128xf32, #tpu.memory_space<vmem>>, %arg16: memref<1x1x128xf32, #tpu.memory_space<vmem>>, %arg17: memref<1x1x128xf32, #tpu.memory_space<vmem>>, %arg18: memref<16x128xf32, #tpu.memory_space<vmem>>, %arg19: memref<16x128xf32, #tpu.memory_space<vmem>>, %arg20: memref<32x128xf32, #tpu.memory_space<vmem>>) attributes {dimension_semantics = [#tpu.dimension_semantics<arbitrary>], iteration_bounds = array<i64: 10>, scalar_prefetch = 0 : i64, scratch_operands = 2 : i64, tpu.core_type = #tpu.core_type<tc>, window_params = [{pipeline_mode = #tpu.pipeline_mode<synchronous>, transform_indices = @transform_0, window_bounds = array<i64: 16, 128>}, {pipeline_mode = #tpu.pipeline_mode<synchronous>, transform_indices = @transform_1, window_bounds = array<i64: 32, 1>}, {pipeline_mode = #tpu.pipeline_mode<synchronous>, transform_indices = @transform_2, window_bounds = array<i64: 32, 16>}, {pipeline_mode = #tpu.pipeline_mode<synchronous>, transform_indices = @transform_3, window_bounds = array<i64: 32, 16>}, {pipeline_mode = #tpu.pipeline_mode<synchronous>, transform_indices = @transform_4, window_bounds = array<i64: 16, 32>}, {pipeline_mode = #tpu.pipeline_mode<synchronous>, transform_indices = @transform_5, window_bounds = array<i64: 128, 128>}, {pipeline_mode = #tpu.pipeline_mode<synchronous>, transform_indices = @transform_6, window_bounds = array<i64: 1, 128>}, {pipeline_mode = #tpu.pipeline_mode<synchronous>, transform_indices = @transform_7, window_bounds = array<i64: 1, 128>}, {pipeline_mode = #tpu.pipeline_mode<synchronous>, transform_indices = @transform_8, window_bounds = array<i64: 1, 128>}, {transform_indices = @transform_9, window_bounds = array<i64: 1, 128, 512>}, {transform_indices = @transform_10, window_bounds = array<i64: 1, 1, 512>}, {transform_indices = @transform_11, window_bounds = array<i64: 1, 128, 128>}, {transform_indices = @transform_12, window_bounds = array<i64: 1, 1, 128>}, {transform_indices = @transform_13, window_bounds = array<i64: 1, 1, 128>}, {transform_indices = @transform_14, window_bounds = array<i64: 1, 1, 128>}, {transform_indices = @transform_15, window_bounds = array<i64: 1, 1, 128>}, {transform_indices = @transform_16, window_bounds = array<i64: 1, 1, 128>}, {pipeline_mode = #tpu.pipeline_mode<synchronous>, transform_indices = @transform_17, window_bounds = array<i64: 16, 128>}]} {
    %c0_i32 = arith.constant 0 : i32
    %0 = arith.cmpi eq, %arg0, %c0_i32 : i32
    %1 = arith.extui %0 : i1 to i32
    %c0_i32_0 = arith.constant 0 : i32
    %2 = arith.cmpi ne, %1, %c0_i32_0 : i32
    scf.if %2 {
      %c0_57 = arith.constant 0 : index
      %c0_58 = arith.constant 0 : index
      %104 = vector.load %arg1[%c0_57, %c0_58] : memref<16x128xf32, #tpu.memory_space<vmem>>, vector<16x128xf32>
      %c0_59 = arith.constant 0 : index
      %c0_60 = arith.constant 0 : index
      %105 = vector.load %arg6[%c0_59, %c0_60] : memref<128x128xf32, #tpu.memory_space<vmem>>, vector<128x128xf32>
      %cst_61 = arith.constant dense<0.000000e+00> : vector<16x128xf32>
      %106 = tpu.matmul %104, %105, %cst_61 {dimension_numbers = #tpu.dot_dimension_numbers<[1], [0], [0], [1], [0, 0, 1, 1], [], []>} : vector<16x128xf32>, vector<128x128xf32>, vector<16x128xf32> -> vector<16x128xf32>
      %c0_62 = arith.constant 0 : index
      %c0_63 = arith.constant 0 : index
      %107 = vector.load %arg7[%c0_62, %c0_63] : memref<1x128xf32, #tpu.memory_space<vmem>>, vector<1x128xf32>
      %108 = vector.broadcast %107 : vector<1x128xf32> to vector<16x128xf32>
      %109 = arith.addf %106, %108 : vector<16x128xf32>
      %c0_64 = arith.constant 0 : index
      %c0_65 = arith.constant 0 : index
      %110 = vector.load %arg19[%c0_64, %c0_65] : memref<16x128xf32, #tpu.memory_space<vmem>>, vector<16x128xf32>
      tpu.vector_store %arg19[%c0_64, %c0_65], %109 {strides = array<i32>} : memref<16x128xf32, #tpu.memory_space<vmem>>, vector<16x128xf32>,
      %c0_66 = arith.constant 0 : index
      %c0_67 = arith.constant 0 : index
      %111 = vector.load %arg2[%c0_66, %c0_67] : memref<32x1xf32, #tpu.memory_space<vmem>>, vector<32x1xf32>
      %c0_68 = arith.constant 0 : index
      %c0_69 = arith.constant 0 : index
      %112 = vector.load %arg8[%c0_68, %c0_69] : memref<1x128xf32, #tpu.memory_space<vmem>>, vector<1x128xf32>
      %113 = vector.broadcast %111 : vector<32x1xf32> to vector<32x128xf32>
      %114 = vector.broadcast %112 : vector<1x128xf32> to vector<32x128xf32>
      %115 = arith.mulf %113, %114 : vector<32x128xf32>
      %c0_70 = arith.constant 0 : index
      %c0_71 = arith.constant 0 : index
      %116 = vector.load %arg9[%c0_70, %c0_71] : memref<1x128xf32, #tpu.memory_space<vmem>>, vector<1x128xf32>
      %117 = vector.broadcast %116 : vector<1x128xf32> to vector<32x128xf32>
      %118 = arith.addf %115, %117 : vector<32x128xf32>
      %c0_72 = arith.constant 0 : index
      %c0_73 = arith.constant 0 : index
      %119 = vector.load %arg20[%c0_72, %c0_73] : memref<32x128xf32, #tpu.memory_space<vmem>>, vector<32x128xf32>
      tpu.vector_store %arg20[%c0_72, %c0_73], %118 {strides = array<i32>} : memref<32x128xf32, #tpu.memory_space<vmem>>, vector<32x128xf32>,
    } else {
    }
    %c0 = arith.constant 0 : index
    %c0_1 = arith.constant 0 : index
    %3 = vector.load %arg19[%c0, %c0_1] : memref<16x128xf32, #tpu.memory_space<vmem>>, vector<16x128xf32>
    %c0_2 = arith.constant 0 : index
    %c0_3 = arith.constant 0 : index
    %4 = vector.load %arg20[%c0_2, %c0_3] : memref<32x128xf32, #tpu.memory_space<vmem>>, vector<32x128xf32>
    %c0_4 = arith.constant 0 : index
    %c0_5 = arith.constant 0 : index
    %c0_6 = arith.constant 0 : index
    %5 = vector.load %arg10[%c0_4, %c0_5, %c0_6] : memref<1x128x512xf32, #tpu.memory_space<vmem>>, vector<1x128x512xf32>
    %6 = vector.shape_cast %5 : vector<1x128x512xf32> to vector<128x512xf32>
    %cst = arith.constant dense<0.000000e+00> : vector<16x512xf32>
    %7 = tpu.matmul %3, %6, %cst {dimension_numbers = #tpu.dot_dimension_numbers<[1], [0], [0], [1], [0, 0, 1, 1], [], []>} : vector<16x128xf32>, vector<128x512xf32>, vector<16x512xf32> -> vector<16x512xf32>
    %c0_7 = arith.constant 0 : index
    %c0_8 = arith.constant 0 : index
    %c0_9 = arith.constant 0 : index
    %8 = vector.load %arg11[%c0_7, %c0_8, %c0_9] : memref<1x1x512xf32, #tpu.memory_space<vmem>>, vector<1x1x512xf32>
    %9 = vector.shape_cast %8 : vector<1x1x512xf32> to vector<1x512xf32>
    %10 = vector.broadcast %9 : vector<1x512xf32> to vector<16x512xf32>
    %11 = arith.addf %7, %10 : vector<16x512xf32>
    %12 = vector.extract_strided_slice %11 {offsets = [0, 256], sizes = [16, 128], strides = [1, 1]} : vector<16x512xf32> to vector<16x128xf32>
    %13 = vector.extract_strided_slice %11 {offsets = [0, 384], sizes = [16, 128], strides = [1, 1]} : vector<16x512xf32> to vector<16x128xf32>
    %c0_10 = arith.constant 0 : index
    %c0_11 = arith.constant 0 : index
    %c0_12 = arith.constant 0 : index
    %14 = vector.load %arg12[%c0_10, %c0_11, %c0_12] : memref<1x128x128xf32, #tpu.memory_space<vmem>>, vector<1x128x128xf32>
    %15 = vector.shape_cast %14 : vector<1x128x128xf32> to vector<128x128xf32>
    %cst_13 = arith.constant dense<0.000000e+00> : vector<32x128xf32>
    %16 = tpu.matmul %4, %15, %cst_13 {dimension_numbers = #tpu.dot_dimension_numbers<[1], [0], [0], [1], [0, 0, 1, 1], [], []>} : vector<32x128xf32>, vector<128x128xf32>, vector<32x128xf32> -> vector<32x128xf32>
    %c0_14 = arith.constant 0 : index
    %c0_15 = arith.constant 0 : index
    %c0_16 = arith.constant 0 : index
    %17 = vector.load %arg13[%c0_14, %c0_15, %c0_16] : memref<1x1x128xf32, #tpu.memory_space<vmem>>, vector<1x1x128xf32>
    %18 = vector.shape_cast %17 : vector<1x1x128xf32> to vector<1x128xf32>
    %19 = vector.broadcast %18 : vector<1x128xf32> to vector<32x128xf32>
    %20 = arith.addf %16, %19 : vector<32x128xf32>
    %c0_17 = arith.constant 0 : index
    %c0_18 = arith.constant 0 : index
    %21 = vector.load %arg3[%c0_17, %c0_18] : memref<32x16xf32, #tpu.memory_space<vmem>>, vector<32x16xf32>
    %22 = vector.extract_strided_slice %11 {offsets = [0, 0], sizes = [16, 256], strides = [1, 1]} : vector<16x512xf32> to vector<16x256xf32>
    %cst_19 = arith.constant dense<0.000000e+00> : vector<32x256xf32>
    %23 = tpu.matmul %21, %22, %cst_19 {dimension_numbers = #tpu.dot_dimension_numbers<[1], [0], [0], [1], [0, 0, 1, 1], [], []>} : vector<32x16xf32>, vector<16x256xf32>, vector<32x256xf32> -> vector<32x256xf32>
    %24 = vector.extract_strided_slice %23 {offsets = [0, 0], sizes = [32, 128], strides = [1, 1]} : vector<32x256xf32> to vector<32x128xf32>
    %25 = vector.extract_strided_slice %23 {offsets = [0, 128], sizes = [32, 128], strides = [1, 1]} : vector<32x256xf32> to vector<32x128xf32>
    %c0_20 = arith.constant 0 : index
    %c0_21 = arith.constant 0 : index
    %26 = vector.load %arg4[%c0_20, %c0_21] : memref<32x16xf32, #tpu.memory_space<vmem>>, vector<32x16xf32>
    %cst_22 = arith.constant dense<0.000000e+00> : vector<32x128xf32>
    %27 = tpu.matmul %26, %13, %cst_22 {dimension_numbers = #tpu.dot_dimension_numbers<[1], [0], [0], [1], [0, 0, 1, 1], [], []>} : vector<32x16xf32>, vector<16x128xf32>, vector<32x128xf32> -> vector<32x128xf32>
    %28 = arith.addf %24, %27 : vector<32x128xf32>
    %29 = arith.addf %28, %20 : vector<32x128xf32>
    %30 = arith.negf %29 : vector<32x128xf32>
    %31 = math.exp %30 : vector<32x128xf32>
    %cst_23 = arith.constant 1.000000e+00 : f32
    %32 = vector.broadcast %cst_23 : f32 to vector<32x128xf32>
    %33 = arith.addf %32, %31 : vector<32x128xf32>
    %34 = arith.divf %32, %33 : vector<32x128xf32>
    %35 = arith.mulf %34, %25 : vector<32x128xf32>
    %36 = tpu.concatenate %35, %34 in 1 : vector<32x128xf32>, vector<32x128xf32> -> vector<32x256xf32>
    %c0_24 = arith.constant 0 : index
    %c0_25 = arith.constant 0 : index
    %37 = vector.load %arg5[%c0_24, %c0_25] : memref<16x32xf32, #tpu.memory_space<vmem>>, vector<16x32xf32>
    %cst_26 = arith.constant dense<0.000000e+00> : vector<16x256xf32>
    %38 = tpu.matmul %37, %36, %cst_26 {dimension_numbers = #tpu.dot_dimension_numbers<[1], [0], [0], [1], [0, 0, 1, 1], [], []>} : vector<16x32xf32>, vector<32x256xf32>, vector<16x256xf32> -> vector<16x256xf32>
    %39 = vector.extract_strided_slice %38 {offsets = [0, 0], sizes = [16, 128], strides = [1, 1]} : vector<16x256xf32> to vector<16x128xf32>
    %40 = vector.extract_strided_slice %38 {offsets = [0, 128], sizes = [16, 128], strides = [1, 1]} : vector<16x256xf32> to vector<16x128xf32>
    %cst_27 = arith.constant 9.99999997E-7 : f32
    %41 = vector.broadcast %cst_27 : f32 to vector<16x128xf32>
    %42 = arith.addf %40, %41 : vector<16x128xf32>
    %43 = arith.divf %39, %42 : vector<16x128xf32>
    %44 = arith.addf %12, %43 : vector<16x128xf32>
    %c0_28 = arith.constant 0 : index
    %c0_29 = arith.constant 0 : index
    %c0_30 = arith.constant 0 : index
    %45 = vector.load %arg14[%c0_28, %c0_29, %c0_30] : memref<1x1x128xf32, #tpu.memory_space<vmem>>, vector<1x1x128xf32>
    %46 = vector.shape_cast %45 : vector<1x1x128xf32> to vector<1x128xf32>
    %c0_31 = arith.constant 0 : index
    %c0_32 = arith.constant 0 : index
    %c0_33 = arith.constant 0 : index
    %47 = vector.load %arg15[%c0_31, %c0_32, %c0_33] : memref<1x1x128xf32, #tpu.memory_space<vmem>>, vector<1x1x128xf32>
    %48 = vector.shape_cast %47 : vector<1x1x128xf32> to vector<1x128xf32>
    %cst_34 = arith.constant dense<0.000000e+00> : vector<128xf32>
    %49 = vector.multi_reduction <add>, %44, %cst_34 [0] : vector<16x128xf32> to vector<128xf32>
    %50 = vector.shape_cast %49 : vector<128xf32> to vector<1x128xf32>
    %cst_35 = arith.constant 1.600000e+01 : f32
    %51 = vector.broadcast %cst_35 : f32 to vector<1x128xf32>
    %52 = arith.divf %50, %51 : vector<1x128xf32>
    %53 = vector.broadcast %52 : vector<1x128xf32> to vector<16x128xf32>
    %54 = arith.subf %44, %53 : vector<16x128xf32>
    %55 = arith.mulf %54, %54 : vector<16x128xf32>
    %cst_36 = arith.constant dense<0.000000e+00> : vector<128xf32>
    %56 = vector.multi_reduction <add>, %55, %cst_36 [0] : vector<16x128xf32> to vector<128xf32>
    %57 = vector.shape_cast %56 : vector<128xf32> to vector<1x128xf32>
    %cst_37 = arith.constant 1.600000e+01 : f32
    %58 = vector.broadcast %cst_37 : f32 to vector<1x128xf32>
    %59 = arith.divf %57, %58 : vector<1x128xf32>
    %cst_38 = arith.constant 9.99999974E-6 : f32
    %60 = vector.broadcast %cst_38 : f32 to vector<1x128xf32>
    %61 = arith.addf %59, %60 : vector<1x128xf32>
    %62 = math.rsqrt %61 : vector<1x128xf32>
    %63 = vector.broadcast %62 : vector<1x128xf32> to vector<16x128xf32>
    %64 = arith.mulf %54, %63 : vector<16x128xf32>
    %65 = vector.broadcast %46 : vector<1x128xf32> to vector<16x128xf32>
    %66 = arith.mulf %64, %65 : vector<16x128xf32>
    %67 = vector.broadcast %48 : vector<1x128xf32> to vector<16x128xf32>
    %68 = arith.addf %66, %67 : vector<16x128xf32>
    %cst_39 = arith.constant 0.000000e+00 : f32
    %69 = vector.broadcast %cst_39 : f32 to vector<16x128xf32>
    %70 = arith.maximumf %68, %69 : vector<16x128xf32>
    %c0_40 = arith.constant 0 : index
    %c0_41 = arith.constant 0 : index
    %c0_42 = arith.constant 0 : index
    %71 = vector.load %arg16[%c0_40, %c0_41, %c0_42] : memref<1x1x128xf32, #tpu.memory_space<vmem>>, vector<1x1x128xf32>
    %72 = vector.shape_cast %71 : vector<1x1x128xf32> to vector<1x128xf32>
    %c0_43 = arith.constant 0 : index
    %c0_44 = arith.constant 0 : index
    %c0_45 = arith.constant 0 : index
    %73 = vector.load %arg17[%c0_43, %c0_44, %c0_45] : memref<1x1x128xf32, #tpu.memory_space<vmem>>, vector<1x1x128xf32>
    %74 = vector.shape_cast %73 : vector<1x1x128xf32> to vector<1x128xf32>
    %cst_46 = arith.constant dense<0.000000e+00> : vector<128xf32>
    %75 = vector.multi_reduction <add>, %29, %cst_46 [0] : vector<32x128xf32> to vector<128xf32>
    %76 = vector.shape_cast %75 : vector<128xf32> to vector<1x128xf32>
    %cst_47 = arith.constant 3.200000e+01 : f32
    %77 = vector.broadcast %cst_47 : f32 to vector<1x128xf32>
    %78 = arith.divf %76, %77 : vector<1x128xf32>
    %79 = vector.broadcast %78 : vector<1x128xf32> to vector<32x128xf32>
    %80 = arith.subf %29, %79 : vector<32x128xf32>
    %81 = arith.mulf %80, %80 : vector<32x128xf32>
    %cst_48 = arith.constant dense<0.000000e+00> : vector<128xf32>
    %82 = vector.multi_reduction <add>, %81, %cst_48 [0] : vector<32x128xf32> to vector<128xf32>
    %83 = vector.shape_cast %82 : vector<128xf32> to vector<1x128xf32>
    %cst_49 = arith.constant 3.200000e+01 : f32
    %84 = vector.broadcast %cst_49 : f32 to vector<1x128xf32>
    %85 = arith.divf %83, %84 : vector<1x128xf32>
    %cst_50 = arith.constant 9.99999974E-6 : f32
    %86 = vector.broadcast %cst_50 : f32 to vector<1x128xf32>
    %87 = arith.addf %85, %86 : vector<1x128xf32>
    %88 = math.rsqrt %87 : vector<1x128xf32>
    %89 = vector.broadcast %88 : vector<1x128xf32> to vector<32x128xf32>
    %90 = arith.mulf %80, %89 : vector<32x128xf32>
    %91 = vector.broadcast %72 : vector<1x128xf32> to vector<32x128xf32>
    %92 = arith.mulf %90, %91 : vector<32x128xf32>
    %93 = vector.broadcast %74 : vector<1x128xf32> to vector<32x128xf32>
    %94 = arith.addf %92, %93 : vector<32x128xf32>
    %cst_51 = arith.constant 0.000000e+00 : f32
    %95 = vector.broadcast %cst_51 : f32 to vector<32x128xf32>
    %96 = arith.maximumf %94, %95 : vector<32x128xf32>
    %97 = arith.addf %3, %70 : vector<16x128xf32>
    %c0_52 = arith.constant 0 : index
    %c0_53 = arith.constant 0 : index
    %98 = vector.load %arg19[%c0_52, %c0_53] : memref<16x128xf32, #tpu.memory_space<vmem>>, vector<16x128xf32>
    tpu.vector_store %arg19[%c0_52, %c0_53], %97 {strides = array<i32>} : memref<16x128xf32, #tpu.memory_space<vmem>>, vector<16x128xf32>,
    %99 = arith.addf %4, %96 : vector<32x128xf32>
    %c0_54 = arith.constant 0 : index
    %c0_55 = arith.constant 0 : index
    %100 = vector.load %arg20[%c0_54, %c0_55] : memref<32x128xf32, #tpu.memory_space<vmem>>, vector<32x128xf32>
    tpu.vector_store %arg20[%c0_54, %c0_55], %99 {strides = array<i32>} : memref<32x128xf32, #tpu.memory_space<vmem>>, vector<32x128xf32>,
    %c9_i32 = arith.constant 9 : i32
    %101 = arith.cmpi eq, %arg0, %c9_i32 : i32
    %102 = arith.extui %101 : i1 to i32
    %c0_i32_56 = arith.constant 0 : i32
    %103 = arith.cmpi ne, %102, %c0_i32_56 : i32
    scf.if %103 {
      %c0_57 = arith.constant 0 : index
      %c0_58 = arith.constant 0 : index
      %104 = vector.load %arg19[%c0_57, %c0_58] : memref<16x128xf32, #tpu.memory_space<vmem>>, vector<16x128xf32>
      %c0_59 = arith.constant 0 : index
      %c0_60 = arith.constant 0 : index
      %105 = vector.load %arg18[%c0_59, %c0_60] : memref<16x128xf32, #tpu.memory_space<vmem>>, vector<16x128xf32>
      tpu.vector_store %arg18[%c0_59, %c0_60], %104 {strides = array<i32>} : memref<16x128xf32, #tpu.memory_space<vmem>>, vector<16x128xf32>,
    } else {
    }
    return
  }
  func.func @transform_0(%arg0: i32) -> (i32, i32) {
    %c0_i32 = arith.constant 0 : i32
    %c0_i32_0 = arith.constant 0 : i32
    %c0_i32_1 = arith.constant 0 : i32
    return %c0_i32, %c0_i32_0 : i32, i32
  }
  func.func @transform_1(%arg0: i32) -> (i32, i32) {
    %c0_i32 = arith.constant 0 : i32
    %c0_i32_0 = arith.constant 0 : i32
    %c0_i32_1 = arith.constant 0 : i32
    return %c0_i32, %c0_i32_0 : i32, i32
  }
  func.func @transform_2(%arg0: i32) -> (i32, i32) {
    %c0_i32 = arith.constant 0 : i32
    %c0_i32_0 = arith.constant 0 : i32
    %c0_i32_1 = arith.constant 0 : i32
    return %c0_i32, %c0_i32_0 : i32, i32
  }
  func.func @transform_3(%arg0: i32) -> (i32, i32) {
    %c0_i32 = arith.constant 0 : i32
    %c0_i32_0 = arith.constant 0 : i32
    %c0_i32_1 = arith.constant 0 : i32
    return %c0_i32, %c0_i32_0 : i32, i32
  }
  func.func @transform_4(%arg0: i32) -> (i32, i32) {
    %c0_i32 = arith.constant 0 : i32
    %c0_i32_0 = arith.constant 0 : i32
    %c0_i32_1 = arith.constant 0 : i32
    return %c0_i32, %c0_i32_0 : i32, i32
  }
  func.func @transform_5(%arg0: i32) -> (i32, i32) {
    %c0_i32 = arith.constant 0 : i32
    %c0_i32_0 = arith.constant 0 : i32
    %c0_i32_1 = arith.constant 0 : i32
    return %c0_i32, %c0_i32_0 : i32, i32
  }
  func.func @transform_6(%arg0: i32) -> (i32, i32) {
    %c0_i32 = arith.constant 0 : i32
    %c0_i32_0 = arith.constant 0 : i32
    %c0_i32_1 = arith.constant 0 : i32
    return %c0_i32, %c0_i32_0 : i32, i32
  }
  func.func @transform_7(%arg0: i32) -> (i32, i32) {
    %c0_i32 = arith.constant 0 : i32
    %c0_i32_0 = arith.constant 0 : i32
    %c0_i32_1 = arith.constant 0 : i32
    return %c0_i32, %c0_i32_0 : i32, i32
  }
  func.func @transform_8(%arg0: i32) -> (i32, i32) {
    %c0_i32 = arith.constant 0 : i32
    %c0_i32_0 = arith.constant 0 : i32
    %c0_i32_1 = arith.constant 0 : i32
    return %c0_i32, %c0_i32_0 : i32, i32
  }
  func.func @transform_9(%arg0: i32) -> (i32, i32, i32) {
    %c0_i32 = arith.constant 0 : i32
    %c0_i32_0 = arith.constant 0 : i32
    %c0_i32_1 = arith.constant 0 : i32
    return %arg0, %c0_i32, %c0_i32_0 : i32, i32, i32
  }
  func.func @transform_10(%arg0: i32) -> (i32, i32, i32) {
    %c0_i32 = arith.constant 0 : i32
    %c0_i32_0 = arith.constant 0 : i32
    %c0_i32_1 = arith.constant 0 : i32
    return %arg0, %c0_i32, %c0_i32_0 : i32, i32, i32
  }
  func.func @transform_11(%arg0: i32) -> (i32, i32, i32) {
    %c0_i32 = arith.constant 0 : i32
    %c0_i32_0 = arith.constant 0 : i32
    %c0_i32_1 = arith.constant 0 : i32
    return %arg0, %c0_i32, %c0_i32_0 : i32, i32, i32
  }
  func.func @transform_12(%arg0: i32) -> (i32, i32, i32) {
    %c0_i32 = arith.constant 0 : i32
    %c0_i32_0 = arith.constant 0 : i32
    %c0_i32_1 = arith.constant 0 : i32
    return %arg0, %c0_i32, %c0_i32_0 : i32, i32, i32
  }
  func.func @transform_13(%arg0: i32) -> (i32, i32, i32) {
    %c0_i32 = arith.constant 0 : i32
    %c0_i32_0 = arith.constant 0 : i32
    %c0_i32_1 = arith.constant 0 : i32
    return %arg0, %c0_i32, %c0_i32_0 : i32, i32, i32
  }
  func.func @transform_14(%arg0: i32) -> (i32, i32, i32) {
    %c0_i32 = arith.constant 0 : i32
    %c0_i32_0 = arith.constant 0 : i32
    %c0_i32_1 = arith.constant 0 : i32
    return %arg0, %c0_i32, %c0_i32_0 : i32, i32, i32
  }
  func.func @transform_15(%arg0: i32) -> (i32, i32, i32) {
    %c0_i32 = arith.constant 0 : i32
    %c0_i32_0 = arith.constant 0 : i32
    %c0_i32_1 = arith.constant 0 : i32
    return %arg0, %c0_i32, %c0_i32_0 : i32, i32, i32
  }
  func.func @transform_16(%arg0: i32) -> (i32, i32, i32) {
    %c0_i32 = arith.constant 0 : i32
    %c0_i32_0 = arith.constant 0 : i32
    %c0_i32_1 = arith.constant 0 : i32
    return %arg0, %c0_i32, %c0_i32_0 : i32, i32, i32
  }
  func.func @transform_17(%arg0: i32) -> (i32, i32) {
    %c0_i32 = arith.constant 0 : i32
    %c0_i32_0 = arith.constant 0 : i32
    %c0_i32_1 = arith.constant 0 : i32
    return %c0_i32, %c0_i32_0 : i32, i32
  }
}

</mosaic_0001>

<bundles_post_ra>
// kernel: gated_gcn_forward.3
= control target key start
LH: loop header
LB: loop body
LE: loop exit
PB: predicated region body
PF: predicated region fallthrough
CT: control target
= control target key end

     0   :  { %s829_s1 = inlined_call_operand.vmem [shape: f32[128,128], index: 1, kind: input, shape index: {}]   ;;  %s830_s0 = inlined_call_operand.vmem [shape: f32[16,128], index: 0, kind: input, shape index: {}]   ;;  %s831_s3 = inlined_call_operand.vmem [shape: f32[128,128], index: 3, kind: input, shape index: {}]   ;;  %s832_s5 = inlined_call_operand.vmem [shape: f32[128,128], index: 5, kind: input, shape index: {}]   ;;  %s833_s2 = inlined_call_operand.vmem [shape: f32[1,128], index: 2, kind: input, shape index: {}]   ;;  %s834_s4 = inlined_call_operand.vmem [shape: f32[1,128], index: 4, kind: input, shape index: {}]   ;;  %s835_s6 = inlined_call_operand.vmem [shape: f32[1,128], index: 6, kind: input, shape index: {}]   ;;  %s836_s7 = inlined_call_operand.vmem [shape: f32[16,128], index: 7, kind: output, shape index: {}]  }
   0x1   :  { %v28_v0 = vld [vmem:[%s829_s1] sm:$0xff]  ;;  %v29_v1 = vld [vmem:[%s829_s1 + $0x8] sm:$0xff]  ;;  %v30_v2 = vld [vmem:[%s829_s1 + $0x10] sm:$0xff] }
   0x2   :  { %v520_v3 = vpack.c.bf16 %v29_v1, %v28_v0  ;;  %v31_v4 = vld [vmem:[%s829_s1 + $0x18] sm:$0xff]  ;;  %v32_v6 = vld [vmem:[%s829_s1 + $0x20] sm:$0xff]  ;;  %v33_v7 = vld [vmem:[%s829_s1 + $0x28] sm:$0xff] }
   0x3   :  { %v524_v5 = vpack.c.bf16 %v31_v4, %v30_v2  ;;  %v528_v8 = vpack.c.bf16 %v33_v7, %v32_v6  ;;  %v34_v9 = vld [vmem:[%s829_s1 + $0x30] sm:$0xff]  ;;  %v35_v10 = vld [vmem:[%s829_s1 + $0x38] sm:$0xff]  ;;  %v26_v11 = vld [vmem:[%s830_s0] sm:$0xff] }
   0x4   :  { %521 = vmatprep.subr.bf16.mxu0 %v520_v3  ;;  %447 = vmatprep.mubr.f32.mxu0 %v26_v11  ;;  %v128_v12 = vld [vmem:[%s831_s3] sm:$0xff]  ;;  %v129_v13 = vld [vmem:[%s831_s3 + $0x8] sm:$0xff]  ;;  %v130_v14 = vld [vmem:[%s831_s3 + $0x10] sm:$0xff]  ;;  %v532_v20 = vpack.c.bf16 %v35_v10, %v34_v9 }
   0x5   :  { %523 = vmatpush3.bf16.msra.mxu0 %v520_v3  ;;  %v552_v15 = vpack.c.bf16 %v129_v13, %v128_v12  ;;  %v131_v16 = vld [vmem:[%s831_s3 + $0x18] sm:$0xff]  ;;  %v132_v18 = vld [vmem:[%s831_s3 + $0x20] sm:$0xff]  ;;  %v133_v19 = vld [vmem:[%s831_s3 + $0x28] sm:$0xff] }
   0x6   :  { %525 = vmatprep.subr.bf16.mxu0 %v524_v5  ;;  %v556_v17 = vpack.c.bf16 %v131_v16, %v130_v14  ;;  %v36_v21 = vld [vmem:[%s829_s1 + $0x40] sm:$0xff]  ;;  %v37_v22 = vld [vmem:[%s829_s1 + $0x48] sm:$0xff]  ;;  %v560_v23 = vpack.c.bf16 %v133_v19, %v132_v18  ;;  %v134_v24 = vld [vmem:[%s831_s3 + $0x30] sm:$0xff] }
   0x7   :  { %553 = vmatprep.subr.bf16.mxu1 %v552_v15  ;;  %v135_v25 = vld [vmem:[%s831_s3 + $0x38] sm:$0xff]  ;;  %v536_v26 = vpack.c.bf16 %v37_v22, %v36_v21  ;;  %v38_v27 = vld [vmem:[%s829_s1 + $0x50] sm:$0xff]  ;;  %v136_v30 = vld [vmem:[%s831_s3 + $0x40] sm:$0xff] }
   0x8   :  { %555 = vmatpush3.bf16.msra.mxu1 %v552_v15  ;;  %v39_v28 = vld [vmem:[%s829_s1 + $0x58] sm:$0xff]  ;;  %v564_v29 = vpack.c.bf16 %v135_v25, %v134_v24  ;;  %v137_v31 = vld [vmem:[%s831_s3 + $0x48] sm:$0xff]  ;;  %v40_v33 = vld [vmem:[%s829_s1 + $0x60] sm:$0xff] }
   0x9   :  { %527 = vmatpush3.bf16.msra.mxu0 %v524_v5  ;;  %557 = vmatprep.subr.bf16.mxu1 %v556_v17  ;;  %v540_v32 = vpack.c.bf16 %v39_v28, %v38_v27  ;;  %v41_v34 = vld [vmem:[%s829_s1 + $0x68] sm:$0xff]  ;;  %v568_v35 = vpack.c.bf16 %v137_v31, %v136_v30  ;;  %v138_v36 = vld [vmem:[%s831_s3 + $0x50] sm:$0xff]  ;;  %v139_v37 = vld [vmem:[%s831_s3 + $0x58] sm:$0xff] }
   0xa   :  { %529 = vmatprep.subr.bf16.mxu0 %v528_v8  ;;  %v544_v38 = vpack.c.bf16 %v41_v34, %v40_v33  ;;  %v42_v39 = vld [vmem:[%s829_s1 + $0x70] sm:$0xff]  ;;  %v43_v40 = vld [vmem:[%s829_s1 + $0x78] sm:$0xff]  ;;  %v572_v41 = vpack.c.bf16 %v139_v37, %v138_v36  ;;  %v140_v42 = vld [vmem:[%s831_s3 + $0x60] sm:$0xff] }
   0xb   :  { %v141_v43 = vld [vmem:[%s831_s3 + $0x68] sm:$0xff]  ;;  %v548_v44 = vpack.c.bf16 %v43_v40, %v42_v39  ;;  %v142_v47 = vld [vmem:[%s831_s3 + $0x70] sm:$0xff]  ;;  %v143_v48 = vld [vmem:[%s831_s3 + $0x78] sm:$0xff] }
   0xc   :  { %559 = vmatpush3.bf16.msra.mxu1 %v556_v17  ;;  %v576_v45 = vpack.c.bf16 %v141_v43, %v140_v42  ;;  %v27_v46 = vld [vmem:[%s830_s0 + $0x8] sm:$0xff]  ;;  %v580_v49 = vpack.c.bf16 %v143_v48, %v142_v47  ;;  %v228_v50 = vld [vmem:[%s832_s5] sm:$0xff]  ;;  %v230_v52 = vld [vmem:[%s832_s5 + $0x10] sm:$0xff] }
   0xd   :  { %531 = vmatpush3.bf16.msra.mxu0 %v528_v8  ;;  %561 = vmatprep.subr.bf16.mxu1 %v560_v23  ;;  %v229_v51 = vld [vmem:[%s832_s5 + $0x8] sm:$0xff]  ;;  %v231_v54 = vld [vmem:[%s832_s5 + $0x18] sm:$0xff]  ;;  %v232_v56 = vld [vmem:[%s832_s5 + $0x20] sm:$0xff] }
   0xe   :  { %533 = vmatprep.subr.bf16.mxu0 %v532_v20  ;;  %v584_v53 = vpack.c.bf16 %v229_v51, %v228_v50  ;;  %v588_v55 = vpack.c.bf16 %v231_v54, %v230_v52  ;;  %v233_v57 = vld [vmem:[%s832_s5 + $0x28] sm:$0xff]  ;;  %v234_v59 = vld [vmem:[%s832_s5 + $0x30] sm:$0xff]  ;;  %v235_v60 = vld [vmem:[%s832_s5 + $0x38] sm:$0xff] }
   0xf   :  { %v592_v58 = vpack.c.bf16 %v233_v57, %v232_v56  ;;  %v596_v61 = vpack.c.bf16 %v235_v60, %v234_v59  ;;  %v236_v62 = vld [vmem:[%s832_s5 + $0x40] sm:$0xff]  ;;  %v237_v63 = vld [vmem:[%s832_s5 + $0x48] sm:$0xff]  ;;  %v238_v1 = vld [vmem:[%s832_s5 + $0x50] sm:$0xff] }
  0x10   :  { %563 = vmatpush3.bf16.msra.mxu1 %v560_v23  ;;  %v600_v0 = vpack.c.bf16 %v237_v63, %v236_v62  ;;  %v239_v2 = vld [vmem:[%s832_s5 + $0x58] sm:$0xff]  ;;  %v240_v4 = vld [vmem:[%s832_s5 + $0x60] sm:$0xff]  ;;  %v241_v5 = vld [vmem:[%s832_s5 + $0x68] sm:$0xff] }
  0x11   :  { %535 = vmatpush3.bf16.msra.mxu0 %v532_v20  ;;  %565 = vmatprep.subr.bf16.mxu1 %v564_v29  ;;  %v604_v3 = vpack.c.bf16 %v239_v2, %v238_v1  ;;  %v608_v6 = vpack.c.bf16 %v241_v5, %v240_v4  ;;  %v358_v7 = vld [vmem:[%s833_s2] ss:$0 sm:$0xff]  ;;  %v242_v14 = vld [vmem:[%s832_s5 + $0x70] sm:$0xff]  ;;  %v243_v15 = vld [vmem:[%s832_s5 + $0x78] sm:$0xff] }
  0x12   :  { %537 = vmatprep.subr.bf16.mxu0 %v536_v26  ;;  %v612_v16 = vpack.c.bf16 %v243_v15, %v242_v14  ;;  %v359_v17 = vld [vmem:[%s834_s4] ss:$0 sm:$0xff] }
  0x13   :  { %v360_v24 = vld [vmem:[%s835_s6] ss:$0 sm:$0xff] }
  0x14   :  { %567 = vmatpush3.bf16.msra.mxu1 %v564_v29 }
  0x15   :  { %539 = vmatpush3.bf16.msra.mxu0 %v536_v26  ;;  %569 = vmatprep.subr.bf16.mxu1 %v568_v35 }
  0x16   :  { %541 = vmatprep.subr.bf16.mxu0 %v540_v32 }
  0x18   :  { %571 = vmatpush3.bf16.msra.mxu1 %v568_v35 }
  0x19   :  { %543 = vmatpush3.bf16.msra.mxu0 %v540_v32  ;;  %573 = vmatprep.subr.bf16.mxu1 %v572_v41 }
  0x1a   :  { %545 = vmatprep.subr.bf16.mxu0 %v544_v38 }
  0x1c   :  { %575 = vmatpush3.bf16.msra.mxu1 %v572_v41 }
  0x1d   :  { %547 = vmatpush3.bf16.msra.mxu0 %v544_v38  ;;  %577 = vmatprep.subr.bf16.mxu1 %v576_v45 }
  0x1e   :  { %549 = vmatprep.subr.bf16.mxu0 %v548_v44 }
  0x20   :  { %579 = vmatpush3.bf16.msra.mxu1 %v576_v45 }
  0x21   :  { %551 = vmatpush3.bf16.msra.mxu0 %v548_v44  ;;  %581 = vmatprep.subr.bf16.mxu1 %v580_v49 }
  0x22   :  { %585 = vmatprep.subr.bf16.mxu0 %v584_v53 }
  0x24   :  { %448 = vmatmul.mubr.f32.vlgmr.msra.gmra.mrb[0].mxu0 %v27_v46  ;;  %583 = vmatpush3.bf16.msra.mxu1 %v580_v49 }
  0x25   :  { %587 = vmatpush3.bf16.msra.mxu0 %v584_v53 }
  0x26   :  { %589 = vmatprep.subr.bf16.mxu0 %v588_v55 }
  0x29   :  { %591 = vmatpush3.bf16.msra.mxu0 %v588_v55 }
  0x2a   :  { %593 = vmatprep.subr.bf16.mxu0 %v592_v58 }
  0x2d   :  { %595 = vmatpush3.bf16.msra.mxu0 %v592_v58 }
  0x2e   :  { %597 = vmatprep.subr.bf16.mxu0 %v596_v61 }
  0x31   :  { %599 = vmatpush3.bf16.msra.mxu0 %v596_v61 }
  0x32   :  { %601 = vmatprep.subr.bf16.mxu0 %v600_v0 }
  0x35   :  { %603 = vmatpush3.bf16.msra.mxu0 %v600_v0 }
  0x36   :  { %605 = vmatprep.subr.bf16.mxu0 %v604_v3 }
  0x39   :  { %607 = vmatpush3.bf16.msra.mxu0 %v604_v3 }
  0x3a   :  { %609 = vmatprep.subr.bf16.mxu0 %v608_v6 }
  0x3d   :  { %611 = vmatpush3.bf16.msra.mxu0 %v608_v6 }
  0x3e   :  { %613 = vmatprep.subr.bf16.mxu0 %v612_v16 }
  0x41   :  { %615 = vmatpush3.bf16.msra.mxu0 %v612_v16 }
  0xf7   :  { %v449_v8 = vpop.f32.mrb[0].mxu0 }
  0xf8   :  { %v123_v9 = vadd.f32 %v449_v8, %v358_v7  ;;  %v117_v10 = vpop.f32.mrb[1].mxu0 }
  0xf9   :  { %v118_v11 = vadd.f32 %v358_v7, %v117_v10 }
  0xfa   :  { %v127_v13 = vmax.f32 %v123_v9, 0.0 }
  0xfb   :  { %v126_v12 = vmax.f32 %v118_v11, 0.0 }
  0xfd   :  { %482 = vmatprep.mubr.f32.mxu1 %v126_v12 }
  0xfe   :  { %483 = vmatmul.mubr.f32.vlgmr.msra.gmra.mrb[0].mxu1 %v127_v13 }
 0x1d1   :  { %v484_v18 = vpop.f32.mrb[0].mxu1 }
 0x1d2   :  { %v223_v19 = vadd.f32 %v484_v18, %v359_v17  ;;  %v217_v20 = vpop.f32.mrb[1].mxu1 }
 0x1d3   :  { %v218_v21 = vadd.f32 %v359_v17, %v217_v20 }
 0x1d4   :  { %v227_v23 = vmax.f32 %v223_v19, 0.0 }
 0x1d5   :  { %v226_v22 = vmax.f32 %v218_v21, 0.0 }
 0x1d7   :  { %517 = vmatprep.mubr.f32.mxu0 %v226_v22 }
 0x1d8   :  { %518 = vmatmul.mubr.f32.vlgmr.msra.gmra.mrb[2].mxu0 %v227_v23 }
 0x2ab   :  { %v519_v25 = vpop.f32.mrb[2].mxu0 }
 0x2ac   :  { %v317_v26 = vpop.f32.mrb[3].mxu0  ;;  %v323_v28 = vadd.f32 %v519_v25, %v360_v24 }
 0x2ad   :  { %v318_v27 = vadd.f32 %v360_v24, %v317_v26 }
 0x2ae   :  { %v327_v30 = vmul.f32 %v323_v28, %v323_v28 }
 0x2af   :  { %v326_v29 = vmul.f32 %v318_v27, %v318_v27 }
 0x2b1   :  { %328 = vadd.xlane.f32.xlu0 %v326_v29 }
 0x2b5   :  { %330 = vadd.xlane.f32.xlu0 %v327_v30 }
 0x33e   :  { %v329_v31 = vpop.xlane.xlu0 %328 }
 0x33f   :  { %616 = vrsqrt.f32 %v329_v31  ;;  %vm334_vm0 = vcmp.eq.f32.partialorder %v329_v31, inf  ;;  %v337_v35 = vand.u32 2147483648, %v329_v31  ;;  %vm336_vm1 = vcmp.eq.f32.partialorder %v329_v31, 0.0 }
 0x342   :  { %v331_v32 = vpop.xlane.xlu0 %330 }
 0x343   :  { %618 = vrsqrt.f32 %v331_v32  ;;  %vm341_vm2 = vcmp.eq.f32.partialorder %v331_v32, inf  ;;  %v344_v41 = vand.u32 2147483648, %v331_v32  ;;  %vm343_vm3 = vcmp.eq.f32.partialorder %v331_v32, 0.0 }
 0x349   :  { %v617_v33 = vpop.eup %616 }
 0x34a   :  { %v333_v34 = vmul.f32 %v617_v33, %v329_v31 }
 0x34c   :  { %v335_v36 = vsel %vm334_vm0, %v329_v31, %v333_v34 }
 0x34d   :  { %v619_v37 = vpop.eup %618  ;;  %v338_v38 = vsel %vm336_vm1, %v337_v35, %v335_v36 }
 0x34e   :  { %v346_v39 = vmax.f32 %v338_v38, 1e-12  ;;  %v340_v40 = vmul.f32 %v619_v37, %v331_v32 }
 0x350   :  { %620 = vrcp.f32 %v346_v39  ;;  %v342_v42 = vsel %vm341_vm2, %v331_v32, %v340_v40 }
 0x351   :  { %v345_v43 = vsel %vm343_vm3, %v344_v41, %v342_v42 }
 0x352   :  { %v347_v44 = vmax.f32 %v345_v43, 1e-12 }
 0x354   :  { %622 = vrcp.f32 %v347_v44 }
 0x35a   :  { %v621_v45 = vpop.eup %620 }
 0x35b   :  { %v349_v46 = vmul.f32 %v621_v45, %v318_v27 }
 0x35d   :  { %352 = vst [vmem:[%s836_s7] sm:$0xff] %v349_v46 }
 0x35e   :  { %v623_v47 = vpop.eup %622 }
 0x35f   :  { %v351_v48 = vmul.f32 %v623_v47, %v323_v28 }
 0x361   :  { %353 = vst [vmem:[%s836_s7 + $0x8] sm:$0xff] %v351_v48 }

// kernel: gated_gcn_forward.2
= control target key start
LH: loop header
LB: loop body
LE: loop exit
PB: predicated region body
PF: predicated region fallthrough
CT: control target
= control target key end

     0   :  { %s3644_s0 = inlined_call_operand.vmem [shape: f32[16,128], index: 0, kind: input, shape index: {}]   ;;  %s3645_s1 = inlined_call_operand.vmem [shape: f32[32,1], index: 1, kind: input, shape index: {}]   ;;  %s3646_s2 = inlined_call_operand.vmem [shape: f32[32,16], index: 2, kind: input, shape index: {}]   ;;  %s3647_s3 = inlined_call_operand.vmem [shape: f32[32,16], index: 3, kind: input, shape index: {}]   ;;  %s3648_s4 = inlined_call_operand.vmem [shape: f32[16,32], index: 4, kind: input, shape index: {}]   ;;  %s3649_s5 = inlined_call_operand.hbm [shape: f32[128,128], index: 5, kind: input, shape index: {}]   ;;  %s3650_s6 = inlined_call_operand.hbm [shape: f32[1,128], index: 6, kind: input, shape index: {}]   ;;  %s3651_s7 = inlined_call_operand.hbm [shape: f32[1,128], index: 7, kind: input, shape index: {}]   ;;  %s3652_s8 = inlined_call_operand.hbm [shape: f32[1,128], index: 8, kind: input, shape index: {}]   ;;  %s3653_s9 = inlined_call_operand.hbm [shape: f32[10,128,512], index: 9, kind: input, shape index: {}]   ;;  %s3654_s10 = inlined_call_operand.hbm [shape: f32[10,1,512], index: 10, kind: input, shape index: {}]   ;;  %s3655_s11 = inlined_call_operand.hbm [shape: f32[10,128,128], index: 11, kind: input, shape index: {}]   ;;  %s3656_s12 = inlined_call_operand.hbm [shape: f32[10,1,128], index: 12, kind: input, shape index: {}]   ;;  %s3657_s13 = inlined_call_operand.hbm [shape: f32[10,1,128], index: 13, kind: input, shape index: {}]   ;;  %s3658_s14 = inlined_call_operand.hbm [shape: f32[10,1,128], index: 14, kind: input, shape index: {}]   ;;  %s3659_s15 = inlined_call_operand.hbm [shape: f32[10,1,128], index: 15, kind: input, shape index: {}]   ;;  %s3660_s16 = inlined_call_operand.hbm [shape: f32[10,1,128], index: 16, kind: input, shape index: {}]   ;;  %s3661_s17 = inlined_call_operand.vmem [shape: f32[16,128], index: 17, kind: output, shape index: {}]  }
   0x1   :  { %3692 = sst [smem:[#allocation30_spill]] %s3644_s0 }
   0x2   :  { %3693 = sst [smem:[#allocation31_spill]] %s3645_s1 }
   0x3   :  { %3694 = sst [smem:[#allocation32_spill]] %s3646_s2 }
   0x4   :  { %3695 = sst [smem:[#allocation33_spill]] %s3647_s3 }
   0x5   :  { %3696 = sst [smem:[#allocation34_spill]] %s3648_s4 }
   0x6   :  { %3697 = sst [smem:[#allocation35_spill]] %s3649_s5 }
   0x7   :  { %3698 = sst [smem:[#allocation36_spill]] %s3652_s8 }
   0x8   :  { %3699 = sst [smem:[#allocation37_spill]] %s3661_s17 }
   0x9   :  { %22 = vsyncpa [#allocation5], 0 }
   0xa   :  { %23 = vsyncpa [#allocation7], 0 }
   0xb   :  { %24 = vsyncpa [#allocation10], 0  ;;  %s2990_s24 = smov 0   ;;  %s2992_s25 = smov 0  }
   0xc   :  { %s2994_s26 = smov 0   ;;  %s2996_s27 = smov 0  }
   0xd LB: > { %3700 = sst [smem:[#allocation23_spill]] %s2872_s25  ;;  %s3009_s28 = sadd.s32 4294967295, %s2880_s27   ;;  %s2880_s27 = sphi %s2996_s27, %s3753_s27   ;;  %s2876_s26 = sphi %s2994_s26, %s3756_s26   ;;  %s2872_s25 = sphi %s2992_s25, %s3755_s25   ;;  %s2868_s24 = sphi %s2990_s24, %s3754_s24  }
   0xe   : > { %3701 = sst [smem:[#allocation24_spill]] %s2876_s26  ;;  %s3012_s29 = sadd.s32 1, %s2880_s27  }
   0xf   : > { %3702 = sst [smem:[#allocation25_spill]] %s3009_s28  ;;  %s223_s0 = ssub.s32 %s2880_s27, %s3012_s29 }
  0x10   : > { %3703 = sst [smem:[#allocation26_spill]] %s3012_s29  ;;  %s226_s30 = sadd.s32 1, %s2876_s26 }
  0x11   : > { %p224_p0 = scmp.eq.s32.totalorder %s223_s0, 0  ;;  %p233_p1 = scmp.ne.s32.totalorder %s2876_s26, %s2872_s25 }
  0x12   : > { %p234_p2 = scmp.eq.s32.totalorder %s2880_s27, 0  ;;  %p239_p3 = scmp.ne.s32.totalorder %s2872_s25, %s2868_s24 }
  0x13   : > { %s3022_s18 = scalar_select %p224_p0, %s2876_s26, %s226_s30  }
  0x14   : > { %p3024_p4 = por %p234_p2, %p233_p1  ;;  %p3670_p5 = scmp.eq.s32.totalorder %s3009_s28, 0 }
  0x15   : > { %3704 = sst [smem:[#allocation27_spill]] %s3022_s18  ;;  %p2007_p6 = scmp.ge.s32.totalorder %s2880_s27, 1 }
  0x16   : > { %p453_p7 = scmp.lt.s32.totalorder %s2880_s27, 11  ;;  %p3033_p8 = por %p3670_p5, %p239_p3 }
  0x17   : > { %s2882_s21 = smov [#allocation4]   ;;  %p2409_p13 = scmp.lt.s32.totalorder %s2880_s27, 10 }
  0x18   : > { %s3706_s1 = scalar_select %p3033_p8, 1, 0 }
  0x19   : > { %p3038_p10 = pnand %p2007_p6, %p453_p7  ;;  %s480_s22 = sshll.u32 %s2882_s21, 4  ;;  %s481_s22 = int_to_ptr.vmem [resolvable:$true] %s480_s22 }
  0x1a   : > { %3707 = sst [smem:[#allocation28_spill]] %s3706_s1  ;;  %s3052_s24 = sand.u32 1, %s2876_s26  }
  0x1b   : > { %s3708_s20 = scalar_select %p3038_p10, 1, 0 }
  0x1c   : > { %p2367_p11 = pneg %p3038_p10  ;;  %s527_s0 = sand.u32 1, %s2880_s27  }
  0x1d   : > { %3709 = sst [smem:[#allocation29_spill]] %s3708_s20  ;;  %p3057_p0 = pnand %p2409_p13, %p3024_p4 }
  0x1e   : > { %p3046_p12 = pnand %p2367_p11, %p3670_p5  ;;  %s3712_s5 = sld [smem:[#allocation35_spill]] }
  0x1f   : > { %s3711_s30 = scalar_select %p3057_p0, 1, 0 }
  0x20   : > { %s3710_s23 = scalar_select %p3046_p12, 1, 0 }
  0x21   : > { %p3069_p2 = pneg %p3046_p12 }
  0x23   : > { %s3713_s3 = scalar_select %p3069_p2, 1, 0 }
  0x24   : > { %s2482_s29 = scalar_lea.hbm %s3712_s5, 2048 }
  0x25   : > { %p2483_p1 = scmp.ne.s32.totalorder %s3712_s5, %s2482_s29  ;;  %p2489_p6 = scmp.lt.u32.totalorder %s2482_s29, %s3712_s5 }
  0x27   : > { %p2485_p3 = pnand %p3069_p2, %p2483_p1 }
  0x29   : > { %p2486_p4 = pneg %p2485_p3 }
  0x2b   : > { %p2491_p7 = pnand %p2489_p6, %p2486_p4 }
  0x2d   : > { %2494 = shalt.err (!%p2491_p7)
}
  0x2e   : > { %s2495_s18 = scalar_lea.vmem %s481_s22, 2048  ;;  %p2503_p5 = scmp.lt.s32.totalorder %s481_s22, %s481_s22 }
  0x2f   : > { %p2496_p11 = scmp.ne.s32.totalorder %s481_s22, %s2495_s18  ;;  %p2504_p8 = scmp.lt.s32.totalorder %s2495_s18, %s2495_s18 }
  0x31   : > { %p2498_p13 = pnand %p2496_p11, %p3069_p2  ;;  %p2505_p10 = por %p2504_p8, %p2503_p5 }
  0x33   : > { %p2499_p9 = pneg %p2498_p13 }
  0x35   : > { %p2506_p0 = pnand %p2505_p10, %p2499_p9 }
  0x37   : > { %2509 = shalt.err (!%p2506_p0)
}
  0x38   : > { %s3686_s4 = smov 128   ;;  %s3687_s17 = smov 8  }
  0x39   : > { %2370 = dma.hbm_to_vmem [thread:$0]  (!%p3046_p12), %s3712_s5, 2048, %s481_s22, [#allocation5], %s3686_s4, %s3686_s4, %s3687_s17  }
  0x3a   : > { %s2013_s21 = sshll.u32 %s3052_s24, 9  ;;  %s2061_s19 = sshll.u32 %s2880_s27, 13 }
  0x3b   : > { %s3093_s1 = scalar_lea.hbm %s3653_s9, %s2061_s19  ;;  %s531_s25 = scalar_lea.vmem [#allocation11], %s2013_s21 }
  0x3c   : > { %s538_s28 = sshll.u32 %s531_s25, 4  ;;  %s3097_s20 = scalar_lea.sflag [#allocation5], %s527_s0  ;;  %s3095_s28 = int_to_ptr.vmem [resolvable:$true] %s538_s28 }
  0x3d   : > { %s2510_s8 = scalar_lea.hbm %s3093_s1, 8192  ;;  %p3714_p8 = scmp.ne.s32.totalorder %s3711_s30, 0 }
  0x3e   : > { %p2511_p5 = scmp.ne.s32.totalorder %s3093_s1, %s2510_s8  ;;  %s2515_s29 = scalar_lea.hbm %s3653_s9, 81920 }
  0x3f   : > { %p3103_p9 = pneg %p3714_p8  ;;  %p2516_p1 = scmp.lt.u32.totalorder %s3093_s1, %s3653_s9 }
  0x40   : > { %p2517_p3 = scmp.lt.u32.totalorder %s2515_s29, %s2510_s8  ;;  %p2519_p6 = scmp.lt.u32.totalorder %s2510_s8, %s3093_s1 }
  0x41   : > { %s3715_s22 = scalar_select %p3103_p9, 1, 0 }
  0x42   : > { %p2513_p10 = pnand %p3103_p9, %p2511_p5  ;;  %p2518_p4 = por %p2517_p3, %p2516_p1 }
  0x44   : > { %p2514_p0 = pneg %p2513_p10  ;;  %p2520_p7 = por %p2519_p6, %p2518_p4 }
  0x46   : > { %p2521_p11 = pnand %p2520_p7, %p2514_p0 }
  0x48   : > { %2524 = shalt.err (!%p2521_p11)
}
  0x49   : > { %s2525_s0 = scalar_lea.vmem %s3095_s28, 8192  ;;  %s2885_s19 = smov [#allocation11]  }
  0x4a   : > { %p2526_p13 = scmp.ne.s32.totalorder %s3095_s28, %s2525_s0  ;;  %s2530_s18 = sshll.u32 %s2885_s19, 4  ;;  %s2531_s18 = int_to_ptr.vmem [resolvable:$false] %s2530_s18 }
  0x4b   : > { %s2532_s2 = scalar_lea.vmem %s2531_s18, 16384  ;;  %p2533_p12 = scmp.lt.s32.totalorder %s3095_s28, %s2531_s18 }
  0x4c   : > { %p2528_p5 = pnand %p2526_p13, %p3103_p9  ;;  %p2534_p2 = scmp.lt.s32.totalorder %s2532_s2, %s2525_s0 }
  0x4e   : > { %p2529_p10 = pneg %p2528_p5  ;;  %p2535_p1 = por %p2534_p2, %p2533_p12 }
  0x50   : > { %p2536_p3 = pnand %p2535_p1, %p2529_p10 }
  0x52   : > { %2539 = shalt.err (!%p2536_p3)
}
  0x53   : > { %s2886_s8 = smov 512   ;;  %s2887_s26 = smov 32  }
  0x54   : > { %2383 = dma.hbm_to_vmem [thread:$0]  (!%p3714_p8), %s3093_s1, 8192, %s3095_s28, %s3097_s20, %s2886_s8, %s2886_s8, %s2887_s26  }
  0x55   : > { %s2016_s29 = sshll.u32 %s3052_s24, 2  ;;  %s2062_s25 = sshll.u32 %s2880_s27, 6 }
  0x56   : > { %s3132_s0 = scalar_lea.hbm %s3654_s10, %s2062_s25  ;;  %s552_s18 = scalar_lea.vmem [#allocation12], %s2016_s29 }
  0x57   : > { %s560_s2 = sshll.u32 %s552_s18, 4  ;;  %s2019_s4 = sshll.u32 %s3052_s24, 7  ;;  %s561_s2 = int_to_ptr.vmem [resolvable:$true] %s560_s2 }
  0x58   : > { %s2540_s17 = scalar_lea.hbm %s3132_s0, 64  ;;  %s2545_s8 = scalar_lea.hbm %s3654_s10, 640 }
  0x59   : > { %p2541_p12 = scmp.ne.s32.totalorder %s3132_s0, %s2540_s17  ;;  %p2546_p4 = scmp.lt.u32.totalorder %s3132_s0, %s3654_s10 }
  0x5a   : > { %p2547_p6 = scmp.lt.u32.totalorder %s2545_s8, %s2540_s17  ;;  %p2549_p11 = scmp.lt.u32.totalorder %s2540_s17, %s3132_s0 }
  0x5b   : > { %p2543_p2 = pnand %p2541_p12, %p3103_p9 }
  0x5c   : > { %p2548_p7 = por %p2547_p6, %p2546_p4 }
  0x5d   : > { %p2544_p0 = pneg %p2543_p2 }
  0x5e   : > { %p2550_p13 = por %p2549_p11, %p2548_p7 }
  0x60   : > { %p2551_p5 = pnand %p2550_p13, %p2544_p0 }
  0x62   : > { %2554 = shalt.err (!%p2551_p5)
}
  0x63   : > { %s2555_s29 = scalar_lea.vmem %s561_s2, 64  ;;  %s2888_s21 = smov [#allocation12]  }
  0x64   : > { %p2556_p10 = scmp.ne.s32.totalorder %s561_s2, %s2555_s29  ;;  %s2560_s19 = sshll.u32 %s2888_s21, 4  ;;  %s2561_s19 = int_to_ptr.vmem [resolvable:$false] %s2560_s19 }
  0x65   : > { %s2562_s18 = scalar_lea.vmem %s2561_s19, 128  ;;  %p2563_p12 = scmp.lt.s32.totalorder %s561_s2, %s2561_s19 }
  0x66   : > { %p2558_p1 = pnand %p2556_p10, %p3103_p9  ;;  %p2564_p2 = scmp.lt.s32.totalorder %s2562_s18, %s2555_s29 }
  0x68   : > { %p2559_p3 = pneg %p2558_p1  ;;  %p2565_p8 = por %p2564_p2, %p2563_p12 }
  0x6a   : > { %p2566_p4 = pnand %p2565_p8, %p2559_p3 }
  0x6c   : > { %2569 = shalt.err (!%p2566_p4)
}
  0x6d   : > { %p3716_p6 = scmp.ne.s32.totalorder %s3711_s30, 0  ;;  %s2063_s17 = sshll.u32 %s2880_s27, 11 }
  0x6e   : > { %s571_s28 = scalar_lea.vmem [#allocation13], %s2019_s4  ;;  %s3159_s25 = scalar_lea.hbm %s3655_s11, %s2063_s17 }
  0x6f   : > { %2386 = dma.hbm_to_vmem [thread:$0]  (!%p3716_p6), %s3132_s0, 64, %s561_s2, %s3097_s20  }
  0x70   : > { %s578_s1 = sshll.u32 %s571_s28, 4  ;;  %s2570_s29 = scalar_lea.hbm %s3159_s25, 2048  ;;  %s3161_s1 = int_to_ptr.vmem [resolvable:$true] %s578_s1 }
  0x71   : > { %p2571_p8 = scmp.ne.s32.totalorder %s3159_s25, %s2570_s29  ;;  %s2575_s4 = scalar_lea.hbm %s3655_s11, 20480 }
  0x72   : > { %p2576_p11 = scmp.lt.u32.totalorder %s3159_s25, %s3655_s11  ;;  %p2577_p13 = scmp.lt.u32.totalorder %s2575_s4, %s2570_s29 }
  0x73   : > { %p2573_p0 = pnand %p2571_p8, %p3103_p9  ;;  %p2579_p10 = scmp.lt.u32.totalorder %s2570_s29, %s3159_s25 }
  0x74   : > { %p2578_p5 = por %p2577_p13, %p2576_p11 }
  0x75   : > { %p2574_p7 = pneg %p2573_p0 }
  0x76   : > { %p2580_p1 = por %p2579_p10, %p2578_p5 }
  0x78   : > { %p2581_p3 = pnand %p2580_p1, %p2574_p7 }
  0x7a   : > { %2584 = shalt.err (!%p2581_p3)
}
  0x7b   : > { %s2585_s18 = scalar_lea.vmem %s3161_s1, 2048  ;;  %s2889_s17 = smov [#allocation13]  }
  0x7c   : > { %p2586_p12 = scmp.ne.s32.totalorder %s3161_s1, %s2585_s18  ;;  %s2590_s28 = sshll.u32 %s2889_s17, 4  ;;  %s2591_s28 = int_to_ptr.vmem [resolvable:$false] %s2590_s28 }
  0x7d   : > { %s2592_s8 = scalar_lea.vmem %s2591_s28, 4096  ;;  %p2593_p8 = scmp.lt.s32.totalorder %s3161_s1, %s2591_s28 }
  0x7e   : > { %p2588_p2 = pnand %p2586_p12, %p3103_p9  ;;  %p2594_p0 = scmp.lt.s32.totalorder %s2592_s8, %s2585_s18 }
  0x80   : > { %p2589_p4 = pneg %p2588_p2  ;;  %p2595_p11 = por %p2594_p0, %p2593_p8 }
  0x82   : > { %p2596_p13 = pnand %p2595_p11, %p2589_p4 }
  0x84   : > { %2599 = shalt.err (!%p2596_p13)
}
  0x85   : > { %s3717_s26 = smov 8   ;;  %s3718_s29 = smov 128  }
  0x86   : > { %2389 = dma.hbm_to_vmem [thread:$0]  (!%p3716_p6), %s3159_s25, 2048, %s3161_s1, %s3097_s20, %s3718_s29, %s3718_s29, %s3717_s26  }
  0x87   : > { %s3189_s0 = sshll.u32 %s2880_s27, 4  ;;  %s591_s19 = scalar_lea.vmem [#allocation14], %s3052_s24 }
  0x88   : > { %s3195_s21 = scalar_lea.hbm %s3656_s12, %s3189_s0  ;;  %s598_s18 = sshll.u32 %s591_s19, 4  ;;  %s599_s18 = int_to_ptr.vmem [resolvable:$true] %s598_s18 }
  0x89   : > { %s2600_s17 = scalar_lea.hbm %s3195_s21, 16  ;;  %s2605_s25 = scalar_lea.hbm %s3656_s12, 160 }
  0x8a   : > { %p2601_p7 = scmp.ne.s32.totalorder %s3195_s21, %s2600_s17  ;;  %p2606_p1 = scmp.lt.u32.totalorder %s3195_s21, %s3656_s12 }
  0x8b   : > { %p2607_p3 = scmp.lt.u32.totalorder %s2605_s25, %s2600_s17  ;;  %p2609_p2 = scmp.lt.u32.totalorder %s2600_s17, %s3195_s21 }
  0x8c   : > { %p2603_p5 = pnand %p2601_p7, %p3103_p9 }
  0x8d   : > { %p2608_p12 = por %p2607_p3, %p2606_p1 }
  0x8e   : > { %p2604_p10 = pneg %p2603_p5 }
  0x8f   : > { %p2610_p4 = por %p2609_p2, %p2608_p12 }
  0x91   : > { %p2611_p8 = pnand %p2610_p4, %p2604_p10 }
  0x93   : > { %2614 = shalt.err (!%p2611_p8)
}
  0x94   : > { %s2615_s26 = scalar_lea.vmem %s599_s18, 16  ;;  %s2890_s29 = smov [#allocation14]  }
  0x95   : > { %p2616_p0 = scmp.ne.s32.totalorder %s599_s18, %s2615_s26  ;;  %s2620_s2 = sshll.u32 %s2890_s29, 4  ;;  %s2621_s2 = int_to_ptr.vmem [resolvable:$false] %s2620_s2 }
  0x96   : > { %s2622_s4 = scalar_lea.vmem %s2621_s2, 32  ;;  %p2623_p7 = scmp.lt.s32.totalorder %s599_s18, %s2621_s2 }
  0x97   : > { %p2618_p11 = pnand %p2616_p0, %p3103_p9  ;;  %p2624_p5 = scmp.lt.s32.totalorder %s2622_s4, %s2615_s26 }
  0x99   : > { %p2619_p13 = pneg %p2618_p11  ;;  %p2625_p6 = por %p2624_p5, %p2623_p7 }
  0x9b   : > { %p2626_p1 = pnand %p2625_p6, %p2619_p13 }
  0x9d   : > { %2629 = shalt.err (!%p2626_p1)
}
  0x9e   : > { %p3719_p3 = scmp.ne.s32.totalorder %s3711_s30, 0  ;;  %s3220_s27 = scalar_lea.hbm %s3657_s13, %s3189_s0 }
  0x9f   : > { %s608_s1 = scalar_lea.vmem [#allocation15], %s3052_s24  ;;  %s2630_s28 = scalar_lea.hbm %s3220_s27, 16 }
  0xa0   : > { %2392 = dma.hbm_to_vmem [thread:$0]  (!%p3719_p3), %s3195_s21, 16, %s599_s18, %s3097_s20  }
  0xa1   : > { %s615_s25 = sshll.u32 %s608_s1, 4  ;;  %p2631_p6 = scmp.ne.s32.totalorder %s3220_s27, %s2630_s28  ;;  %s616_s25 = int_to_ptr.vmem [resolvable:$true] %s615_s25 }
  0xa2   : > { %s2635_s21 = scalar_lea.hbm %s3657_s13, 160  ;;  %p2636_p2 = scmp.lt.u32.totalorder %s3220_s27, %s3657_s13 }
  0xa3   : > { %p2633_p10 = pnand %p2631_p6, %p3103_p9  ;;  %p2637_p4 = scmp.lt.u32.totalorder %s2635_s21, %s2630_s28 }
  0xa4   : > { %p2639_p0 = scmp.lt.u32.totalorder %s2630_s28, %s3220_s27 }
  0xa5   : > { %p2634_p12 = pneg %p2633_p10  ;;  %p2638_p8 = por %p2637_p4, %p2636_p2 }
  0xa7   : > { %p2640_p11 = por %p2639_p0, %p2638_p8 }
  0xa9   : > { %p2641_p13 = pnand %p2640_p11, %p2634_p12 }
  0xab   : > { %2644 = shalt.err (!%p2641_p13)
}
  0xac   : > { %s2645_s2 = scalar_lea.vmem %s616_s25, 16  ;;  %s2891_s4 = smov [#allocation15]  }
  0xad   : > { %p2646_p7 = scmp.ne.s32.totalorder %s616_s25, %s2645_s2  ;;  %s2650_s19 = sshll.u32 %s2891_s4, 4  ;;  %s2651_s19 = int_to_ptr.vmem [resolvable:$false] %s2650_s19 }
  0xae   : > { %s2652_s17 = scalar_lea.vmem %s2651_s19, 32  ;;  %p2653_p6 = scmp.lt.s32.totalorder %s616_s25, %s2651_s19 }
  0xaf   : > { %p2648_p5 = pnand %p2646_p7, %p3103_p9  ;;  %p2654_p10 = scmp.lt.s32.totalorder %s2652_s17, %s2645_s2 }
  0xb1   : > { %p2649_p1 = pneg %p2648_p5  ;;  %p2655_p3 = por %p2654_p10, %p2653_p6 }
  0xb3   : > { %p2656_p2 = pnand %p2655_p3, %p2649_p1 }
  0xb5   : > { %2659 = shalt.err (!%p2656_p2)
}
  0xb6   : > { %p3720_p4 = scmp.ne.s32.totalorder %s3711_s30, 0  ;;  %s3245_s8 = scalar_lea.hbm %s3658_s14, %s3189_s0 }
  0xb7   : > { %s625_s26 = scalar_lea.vmem [#allocation16], %s3052_s24  ;;  %s2660_s18 = scalar_lea.hbm %s3245_s8, 16 }
  0xb8   : > { %2395 = dma.hbm_to_vmem [thread:$0]  (!%p3720_p4), %s3220_s27, 16, %s616_s25, %s3097_s20  }
  0xb9   : > { %s632_s21 = sshll.u32 %s625_s26, 4  ;;  %p2661_p3 = scmp.ne.s32.totalorder %s3245_s8, %s2660_s18  ;;  %s633_s21 = int_to_ptr.vmem [resolvable:$true] %s632_s21 }
  0xba   : > { %s2665_s27 = scalar_lea.hbm %s3658_s14, 160  ;;  %p2666_p0 = scmp.lt.u32.totalorder %s3245_s8, %s3658_s14 }
  0xbb   : > { %p2663_p12 = pnand %p2661_p3, %p3103_p9  ;;  %p2667_p11 = scmp.lt.u32.totalorder %s2665_s27, %s2660_s18 }
  0xbc   : > { %p2669_p7 = scmp.lt.u32.totalorder %s2660_s18, %s3245_s8 }
  0xbd   : > { %p2664_p8 = pneg %p2663_p12  ;;  %p2668_p13 = por %p2667_p11, %p2666_p0 }
  0xbf   : > { %p2670_p5 = por %p2669_p7, %p2668_p13 }
  0xc1   : > { %p2671_p1 = pnand %p2670_p5, %p2664_p8 }
  0xc3   : > { %2674 = shalt.err (!%p2671_p1)
}
  0xc4   : > { %s2675_s19 = scalar_lea.vmem %s633_s21, 16  ;;  %s2892_s17 = smov [#allocation16]  }
  0xc5   : > { %p2676_p6 = scmp.ne.s32.totalorder %s633_s21, %s2675_s19  ;;  %s2680_s1 = sshll.u32 %s2892_s17, 4  ;;  %s2681_s1 = int_to_ptr.vmem [resolvable:$false] %s2680_s1 }
  0xc6   : > { %s2682_s28 = scalar_lea.vmem %s2681_s1, 32  ;;  %p2683_p3 = scmp.lt.s32.totalorder %s633_s21, %s2681_s1 }
  0xc7   : > { %p2678_p10 = pnand %p2676_p6, %p3103_p9  ;;  %p2684_p12 = scmp.lt.s32.totalorder %s2682_s28, %s2675_s19 }
  0xc9   : > { %p2679_p2 = pneg %p2678_p10  ;;  %p2685_p4 = por %p2684_p12, %p2683_p3 }
  0xcb   : > { %p2686_p0 = pnand %p2685_p4, %p2679_p2 }
  0xcd   : > { %2689 = shalt.err (!%p2686_p0)
}
  0xce   : > { %p3721_p11 = scmp.ne.s32.totalorder %s3711_s30, 0  ;;  %s2893_s26 = smov [#allocation6]  }
  0xcf   : > { %s494_s18 = sshll.u32 %s2893_s26, 4  ;;  %s3270_s27 = scalar_lea.hbm %s3659_s15, %s3189_s0  ;;  %s495_s18 = int_to_ptr.vmem [resolvable:$true] %s494_s18 }
  0xd0   : > { %2398 = dma.hbm_to_vmem [thread:$0]  (!%p3721_p11), %s3245_s8, 16, %s633_s21, %s3097_s20  }
  0xd1   : > { %s2690_s19 = scalar_lea.hbm %s3650_s6, 16  ;;  %p3722_p8 = scmp.ne.s32.totalorder %s3713_s3, 0 }
  0xd2   : > { %p2691_p4 = scmp.ne.s32.totalorder %s3650_s6, %s2690_s19  ;;  %p2697_p5 = scmp.lt.u32.totalorder %s2690_s19, %s3650_s6 }
  0xd4   : > { %p2693_p13 = pnand %p2691_p4, %p3722_p8 }
  0xd6   : > { %p2694_p7 = pneg %p2693_p13 }
  0xd8   : > { %p2699_p1 = pnand %p2697_p5, %p2694_p7 }
  0xda   : > { %2702 = shalt.err (!%p2699_p1)
}
  0xdb   : > { %s2703_s28 = scalar_lea.vmem %s495_s18, 16  ;;  %s2710_s26 = scalar_lea.vmem %s495_s18, 32 }
  0xdc   : > { %p2704_p6 = scmp.ne.s32.totalorder %s495_s18, %s2703_s28  ;;  %p2711_p3 = scmp.lt.s32.totalorder %s495_s18, %s495_s18 }
  0xdd   : > { %p2712_p12 = scmp.lt.s32.totalorder %s2710_s26, %s2703_s28 }
  0xde   : > { %p2706_p10 = pnand %p2704_p6, %p3722_p8 }
  0xdf   : > { %p2713_p0 = por %p2712_p12, %p2711_p3 }
  0xe0   : > { %p2707_p2 = pneg %p2706_p10 }
  0xe2   : > { %p2714_p11 = pnand %p2713_p0, %p2707_p2 }
  0xe4   : > { %2717 = shalt.err (!%p2714_p11)
}
  0xe5   : > { %p3723_p4 = scmp.ne.s32.totalorder %s3710_s23, 0  ;;  %s642_s25 = scalar_lea.vmem [#allocation17], %s3052_s24 }
  0xe6   : > { %s649_s4 = sshll.u32 %s642_s25, 4  ;;  %s2894_s19 = smov [#allocation8]   ;;  %s3291_s4 = int_to_ptr.vmem [resolvable:$true] %s649_s4 }
  0xe7   : > { %2373 = dma.hbm_to_vmem [thread:$0]  (!%p3723_p4), %s3650_s6, 16, %s495_s18, [#allocation7]  }
  0xe8   : > { %s505_s17 = sshll.u32 %s2894_s19, 4  ;;  %s2718_s1 = scalar_lea.hbm %s3270_s27, 16  ;;  %s506_s17 = int_to_ptr.vmem [resolvable:$true] %s505_s17 }
  0xe9   : > { %p2719_p11 = scmp.ne.s32.totalorder %s3270_s27, %s2718_s1  ;;  %s2723_s28 = scalar_lea.hbm %s3659_s15, 160 }
  0xea   : > { %p2724_p5 = scmp.lt.u32.totalorder %s3270_s27, %s3659_s15  ;;  %p2725_p1 = scmp.lt.u32.totalorder %s2723_s28, %s2718_s1 }
  0xeb   : > { %p2721_p13 = pnand %p2719_p11, %p3103_p9  ;;  %p2727_p10 = scmp.lt.u32.totalorder %s2718_s1, %s3270_s27 }
  0xec   : > { %p2726_p6 = por %p2725_p1, %p2724_p5 }
  0xed   : > { %p2722_p7 = pneg %p2721_p13 }
  0xee   : > { %p2728_p2 = por %p2727_p10, %p2726_p6 }
  0xf0   : > { %p2729_p3 = pnand %p2728_p2, %p2722_p7 }
  0xf2   : > { %2732 = shalt.err (!%p2729_p3)
}
  0xf3   : > { %s2733_s18 = scalar_lea.vmem %s3291_s4, 16  ;;  %s2895_s2 = smov [#allocation17]  }
  0xf4   : > { %p2734_p12 = scmp.ne.s32.totalorder %s3291_s4, %s2733_s18  ;;  %s2738_s25 = sshll.u32 %s2895_s2, 4  ;;  %s2739_s25 = int_to_ptr.vmem [resolvable:$false] %s2738_s25 }
  0xf5   : > { %s2740_s19 = scalar_lea.vmem %s2739_s25, 32  ;;  %p2741_p13 = scmp.lt.s32.totalorder %s3291_s4, %s2739_s25 }
  0xf6   : > { %p2736_p0 = pnand %p2734_p12, %p3103_p9  ;;  %p2742_p4 = scmp.lt.s32.totalorder %s2740_s19, %s2733_s18 }
  0xf8   : > { %p2737_p11 = pneg %p2736_p0  ;;  %p2743_p5 = por %p2742_p4, %p2741_p13 }
  0xfa   : > { %p2744_p1 = pnand %p2743_p5, %p2737_p11 }
  0xfc   : > { %2747 = shalt.err (!%p2744_p1)
}
  0xfd   : > { %p3724_p7 = scmp.ne.s32.totalorder %s3711_s30, 0  ;;  %s2748_s21 = scalar_lea.hbm %s3651_s7, 16 }
  0xfe   : > { %p2749_p6 = scmp.ne.s32.totalorder %s3651_s7, %s2748_s21  ;;  %p2755_p2 = scmp.lt.u32.totalorder %s2748_s21, %s3651_s7 }
  0xff   : > { %2401 = dma.hbm_to_vmem [thread:$0]  (!%p3724_p7), %s3270_s27, 16, %s3291_s4, %s3097_s20  }
 0x100   : > { %p2751_p4 = pnand %p2749_p6, %p3722_p8 }
 0x102   : > { %p2752_p10 = pneg %p2751_p4 }
 0x104   : > { %p2757_p3 = pnand %p2755_p2, %p2752_p10 }
 0x106   : > { %2760 = shalt.err (!%p2757_p3)
}
 0x107   : > { %s2761_s2 = scalar_lea.vmem %s506_s17, 16  ;;  %s2768_s27 = scalar_lea.vmem %s506_s17, 32 }
 0x108   : > { %p2762_p12 = scmp.ne.s32.totalorder %s506_s17, %s2761_s2  ;;  %p2769_p13 = scmp.lt.s32.totalorder %s506_s17, %s506_s17 }
 0x109   : > { %p2770_p5 = scmp.lt.s32.totalorder %s2768_s27, %s2761_s2 }
 0x10a   : > { %p2764_p0 = pnand %p2762_p12, %p3722_p8 }
 0x10b   : > { %p2771_p1 = por %p2770_p5, %p2769_p13 }
 0x10c   : > { %p2765_p11 = pneg %p2764_p0 }
 0x10e   : > { %p2772_p7 = pnand %p2771_p1, %p2765_p11 }
 0x110   : > { %2775 = shalt.err (!%p2772_p7)
}
 0x111   : > { %p3725_p6 = scmp.ne.s32.totalorder %s3710_s23, 0  ;;  %s2896_s19 = smov [#allocation9]  }
 0x112   : > { %s516_s1 = sshll.u32 %s2896_s19, 4  ;;  %s3337_s28 = scalar_lea.hbm %s3660_s16, %s3189_s0  ;;  %s517_s1 = int_to_ptr.vmem [resolvable:$true] %s516_s1 }
 0x113   : > { %2376 = dma.hbm_to_vmem [thread:$0]  (!%p3725_p6), %s3651_s7, 16, %s506_s17, [#allocation7]  }
 0x114   : > { %s3726_s18 = sld [smem:[#allocation36_spill]] }
 0x11a   : > { %s2776_s2 = scalar_lea.hbm %s3726_s18, 16 }
 0x11b   : > { %p2777_p7 = scmp.ne.s32.totalorder %s3726_s18, %s2776_s2  ;;  %p2783_p2 = scmp.lt.u32.totalorder %s2776_s2, %s3726_s18 }
 0x11d   : > { %p2779_p4 = pnand %p2777_p7, %p3722_p8 }
 0x11f   : > { %p2780_p10 = pneg %p2779_p4 }
 0x121   : > { %p2785_p3 = pnand %p2783_p2, %p2780_p10 }
 0x123   : > { %2788 = shalt.err (!%p2785_p3)
}
 0x124   : > { %s2789_s25 = scalar_lea.vmem %s517_s1, 16  ;;  %s2796_s0 = scalar_lea.vmem %s517_s1, 32 }
 0x125   : > { %p2790_p12 = scmp.ne.s32.totalorder %s517_s1, %s2789_s25  ;;  %p2797_p13 = scmp.lt.s32.totalorder %s517_s1, %s517_s1 }
 0x126   : > { %p2798_p5 = scmp.lt.s32.totalorder %s2796_s0, %s2789_s25 }
 0x127   : > { %p2792_p0 = pnand %p2790_p12, %p3722_p8 }
 0x128   : > { %p2799_p1 = por %p2798_p5, %p2797_p13 }
 0x129   : > { %p2793_p11 = pneg %p2792_p0 }
 0x12b   : > { %p2800_p9 = pnand %p2799_p1, %p2793_p11 }
 0x12d   : > { %2803 = shalt.err (!%p2800_p9)
}
 0x12e   : > { %2379 = dma.hbm_to_vmem [thread:$0]  (!%p3725_p6), %s3726_s18, 16, %s517_s1, [#allocation10]  }
 0x12f   : > { %s659_s3 = scalar_lea.vmem [#allocation18], %s3052_s24  ;;  %s2804_s21 = scalar_lea.hbm %s3337_s28, 16 }
 0x130   : > { %s666_s8 = sshll.u32 %s659_s3, 4  ;;  %p2805_p8 = scmp.ne.s32.totalorder %s3337_s28, %s2804_s21  ;;  %s667_s8 = int_to_ptr.vmem [resolvable:$true] %s666_s8 }
 0x131   : > { %p3727_p7 = scmp.ne.s32.totalorder %s3715_s22, 0  ;;  %s2809_s29 = scalar_lea.hbm %s3660_s16, 160 }
 0x132   : > { %p2810_p10 = scmp.lt.u32.totalorder %s3337_s28, %s3660_s16  ;;  %p2811_p2 = scmp.lt.u32.totalorder %s2809_s29, %s2804_s21 }
 0x133   : > { %p2807_p4 = pnand %p2805_p8, %p3727_p7  ;;  %p2813_p12 = scmp.lt.u32.totalorder %s2804_s21, %s3337_s28 }
 0x134   : > { %p2812_p3 = por %p2811_p2, %p2810_p10 }
 0x135   : > { %p2808_p9 = pneg %p2807_p4 }
 0x136   : > { %p2814_p6 = por %p2813_p12, %p2812_p3 }
 0x138   : > { %p2815_p0 = pnand %p2814_p6, %p2808_p9 }
 0x13a   : > { %2818 = shalt.err (!%p2815_p0)
}
 0x13b   : > { %s2819_s24 = scalar_lea.vmem %s667_s8, 16  ;;  %s2897_s1 = smov [#allocation18]  }
 0x13c   : > { %p2820_p11 = scmp.ne.s32.totalorder %s667_s8, %s2819_s24  ;;  %s2824_s17 = sshll.u32 %s2897_s1, 4  ;;  %s2825_s17 = int_to_ptr.vmem [resolvable:$false] %s2824_s17 }
 0x13d   : > { %s2826_s4 = scalar_lea.vmem %s2825_s17, 32  ;;  %p2827_p1 = scmp.lt.s32.totalorder %s667_s8, %s2825_s17 }
 0x13e   : > { %p2822_p13 = pnand %p2820_p11, %p3727_p7  ;;  %p2828_p8 = scmp.lt.s32.totalorder %s2826_s4, %s2819_s24 }
 0x140   : > { %p2823_p5 = pneg %p2822_p13  ;;  %p2829_p4 = por %p2828_p8, %p2827_p1 }
 0x142   : > { %p2830_p2 = pnand %p2829_p4, %p2823_p5 }
 0x144   : > { %2833 = shalt.err (!%p2830_p2)
}
 0x145   : > { %p3728_p10 = scmp.ne.s32.totalorder %s3711_s30, 0  ;;  %s3729_s25 = sld [smem:[#allocation29_spill]] }
 0x147   : > { %2404 = dma.hbm_to_vmem [thread:$0]  (!%p3728_p10), %s3337_s28, 16, %s667_s8, %s3097_s20  }
 0x14b   : > { %p3730_p9 = scmp.ne.s32.totalorder %s3729_s25, 0 }
 0x14c   : > { %s3731_s22 = sld [smem:[#allocation25_spill]] (!%p3730_p9) }
 0x14d   : > { %675 = sbr.rel (%p3730_p9) target bundleno = 1448 (0x5a8), region = 88 }
 0x152   : > { %p3732_p7 = scmp.eq.s32.totalorder (!%p3730_p9), %s3731_s22, 0 }
 0x154   : > { %2851 = dma.done.wait (%p3732_p7), [#allocation5], 2048   ;;  %p3733_p3 = pmov %p3732_p7 }
 0x156   : > { %2853 = vsyncadd (%p3733_p3), [#allocation5], 4294965248  ;;  %p3734_p12 = pmov %p3733_p3 }
 0x157   : > { %p3735_p6 = pmov %p3733_p3 }
 0x158   : > { %2855 = dma.done.wait (%p3734_p12), [#allocation7], 32  }
 0x159   : > { %2857 = vsyncadd (%p3735_p6), [#allocation7], 4294967264  ;;  %p3736_p0 = pmov %p3733_p3 }
 0x15b   : > { %2859 = dma.done.wait (%p3736_p0), [#allocation10], 16   ;;  %p3737_p11 = pmov %p3736_p0 }
 0x15c   : > { %s3738_s20 = sld [smem:[#allocation23_spill]]  ;;  %s3739_s30 = sld [smem:[#allocation28_spill]] }
 0x15d   : > { %2861 = vsyncadd (%p3737_p11), [#allocation10], 4294967280  ;;  %s693_s28 = sand.u32 1, %s3731_s22  }
 0x15e   : > { %s694_s19 = scalar_lea.sflag [#allocation5], %s693_s28 }
 0x162   : > { %s3392_s0 = sand.u32 1, %s3738_s20   ;;  %p3740_p13 = scmp.ne.s32.totalorder %s3739_s30, 0 }
 0x163   : > { %s2032_s5 = sshll.u32 %s3392_s0, 9 }
 0x164   : > { %s3395_s3 = scalar_lea.vmem [#allocation11], %s2032_s5 }
 0x165   : > { %2863 = dma.done.wait (%p3740_p13), %s694_s19, 10384  }
 0x166   : > { %2865 = vsyncadd (%p3740_p13), %s694_s19, 4294956912  ;;  %s2033_s8 = sshll.u32 %s3392_s0, 2  ;;  %s2034_s21 = sshll.u32 %s3392_s0, 7 }
 0x167   : > { %s3403_s26 = scalar_lea.vmem [#allocation12], %s2033_s8  ;;  %s3405_s23 = scalar_lea.vmem [#allocation13], %s2034_s21 }
 0x168   : > { %s723_s29 = scalar_lea.vmem [#allocation14], %s3392_s0  ;;  %s731_s2 = scalar_lea.vmem [#allocation15], %s3392_s0 }
 0x169   : > { %s747_s24 = scalar_lea.vmem [#allocation17], %s3392_s0  ;;  %s755_s1 = scalar_lea.vmem [#allocation18], %s3392_s0 }
 0x16a   : > { %p3741_p5 = scmp.ne.s32.totalorder %s3731_s22, 0 }
 0x16b   : > { %v837_v0 = vld [vmem:[#allocation4] sm:$0xff] (!%p3741_p5)  ;;  %v838_v1 = vld [vmem:[#allocation4 + $0x8] sm:$0xff] (!%p3741_p5)  ;;  %v839_v2 = vld [vmem:[#allocation4 + $0x10] sm:$0xff] (!%p3741_p5)  ;;  %v2898_v5 = vmov (!%p3741_p5), 0   ;;  %s3742_s25 = sld [smem:[#allocation30_spill]] (!%p3741_p5)  ;;  %s3744_s28 = sld [smem:[#allocation31_spill]] (!%p3741_p5) }
 0x16c   : > { %834 = sbr.rel (%p3741_p5) target bundleno = 614 (0x266), region = 140  ;;  %v2191_v3 = vpack.c.bf16 (!%p3741_p5), %v838_v1, %v837_v0  ;;  %v840_v4 = vld [vmem:[#allocation4 + $0x18] sm:$0xff] (!%p3741_p5)  ;;  %2457 = vset.pattern.permute.xlu1 (!%p3741_p5), %v2898_v5  ;;  %2456 = vset.pattern.permute.xlu0 (!%p3741_p5), %v2898_v5  ;;  %v841_v7 = vld [vmem:[#allocation4 + $0x20] sm:$0xff] (!%p3741_p5)  ;;  %v842_v8 = vld [vmem:[#allocation4 + $0x28] sm:$0xff] (!%p3741_p5) }
 0x16d   : > { %v2195_v6 = vpack.c.bf16 (!%p3741_p5), %v840_v4, %v839_v2  ;;  %v2199_v9 = vpack.c.bf16 (!%p3741_p5), %v842_v8, %v841_v7  ;;  %v843_v10 = vld [vmem:[#allocation4 + $0x30] sm:$0xff] (!%p3741_p5)  ;;  %v844_v12 = vld [vmem:[#allocation4 + $0x38] sm:$0xff] (!%p3741_p5)  ;;  %v845_v18 = vld [vmem:[#allocation4 + $0x40] sm:$0xff] (!%p3741_p5) }
 0x16e   : > { %2192 = vmatprep.subr.bf16.mxu0 (!%p3741_p5), %v2191_v3  ;;  %v2203_v17 = vpack.c.bf16 (!%p3741_p5), %v844_v12, %v843_v10  ;;  %v846_v19 = vld [vmem:[#allocation4 + $0x48] sm:$0xff] (!%p3741_p5)  ;;  %v847_v21 = vld [vmem:[#allocation4 + $0x50] sm:$0xff] (!%p3741_p5)  ;;  %v848_v22 = vld [vmem:[#allocation4 + $0x58] sm:$0xff] (!%p3741_p5) }
 0x16f   : > { %2194 = vmatpush3.bf16.msra.mxu0 (!%p3741_p5), %v2191_v3  ;;  %v2207_v20 = vpack.c.bf16 (!%p3741_p5), %v846_v19, %v845_v18  ;;  %v2211_v23 = vpack.c.bf16 (!%p3741_p5), %v848_v22, %v847_v21  ;;  %v849_v24 = vld [vmem:[#allocation4 + $0x60] sm:$0xff] (!%p3741_p5)  ;;  %v850_v25 = vld [vmem:[#allocation4 + $0x68] sm:$0xff] (!%p3741_p5)  ;;  %v851_v27 = vld [vmem:[#allocation4 + $0x70] sm:$0xff] (!%p3741_p5) }
 0x170   : > { %2196 = vmatprep.subr.bf16.mxu0 (!%p3741_p5), %v2195_v6  ;;  %v2215_v26 = vpack.c.bf16 (!%p3741_p5), %v850_v25, %v849_v24  ;;  %v852_v28 = vld [vmem:[#allocation4 + $0x78] sm:$0xff] (!%p3741_p5)  ;;  %v2037_v31 = vld [vmem:[#allocation8] ss:$0 sm:$0xff] (!%p3741_p5)  ;;  %v2038_v32 = vld [vmem:[#allocation9] ss:$0 sm:$0xff] (!%p3741_p5) }
 0x171   : > { %s3743_s22 = smov (!%p3741_p5), %s3742_s25  ;;  %v835_v11 = vld [vmem:[%s3742_s25] sm:$0xff] (!%p3741_p5)  ;;  %v939_v13 = vld [vmem:[%s3744_s28 + $0x10] sm:$0xff] (!%p3741_p5)  ;;  %v940_v15 = vld [vmem:[%s3744_s28 + $0x18] sm:$0xff] (!%p3741_p5)  ;;  %v2219_v29 = vpack.c.bf16 (!%p3741_p5), %v852_v28, %v851_v27 }
 0x172   : > { %2140 = vmatprep.mubr.f32.mxu0 (!%p3741_p5), %v835_v11  ;;  %v937_v14 = vld [vmem:[%s3744_s28] sm:$0xff] (!%p3741_p5)  ;;  %954 = vperm.xlu1 (!%p3741_p5), %2457, %v939_v13   ;;  %v938_v16 = vld [vmem:[%s3744_s28 + $0x8] sm:$0xff] (!%p3741_p5)  ;;  %v2036_v45 = vld [vmem:[#allocation6] ss:$0 sm:$0xff] (!%p3741_p5) }
 0x173   : > { %944 = vperm.xlu0 %2456, %v937_v14   ;;  %2198 = vmatpush3.bf16.msra.mxu0 %v2195_v6  ;;  %v836_v30 = vld [vmem:[%s3743_s22 + $0x8] sm:$0xff] }
 0x174   : > { %2200 = vmatprep.subr.bf16.mxu0 %v2199_v9 }
 0x176   : > { %959 = vperm.xlu1 %2457, %v940_v15  }
 0x177   : > { %949 = vperm.xlu0 %2456, %v938_v16   ;;  %2202 = vmatpush3.bf16.msra.mxu0 %v2199_v9 }
 0x178   : > { %2204 = vmatprep.subr.bf16.mxu0 %v2203_v17 }
 0x17b   : > { %2206 = vmatpush3.bf16.msra.mxu0 %v2203_v17 }
 0x17c   : > { %2208 = vmatprep.subr.bf16.mxu0 %v2207_v20 }
 0x17f   : > { %2210 = vmatpush3.bf16.msra.mxu0 %v2207_v20 }
 0x180   : > { %2212 = vmatprep.subr.bf16.mxu0 %v2211_v23 }
 0x183   : > { %2214 = vmatpush3.bf16.msra.mxu0 %v2211_v23 }
 0x184   : > { %2216 = vmatprep.subr.bf16.mxu0 %v2215_v26 }
 0x187   : > { %2218 = vmatpush3.bf16.msra.mxu0 %v2215_v26 }
 0x188   : > { %2220 = vmatprep.subr.bf16.mxu0 %v2219_v29 }
 0x18b   : > { %2222 = vmatpush3.bf16.msra.mxu0 %v2219_v29 }
 0x18e   : > { %2141 = vmatmul.mubr.f32.vlgmr.msra.gmra.mrb[0].mxu0 %v836_v30 }
 0x1f1   : > { %v955_v33 = vpop.permute.xlu1 %954 }
 0x1f2   : > { %v945_v34 = vpop.permute.xlu0 %944  ;;  %v970_v35 = vmul.f32 %v2037_v31, %v955_v33 }
 0x1f3   : > { %v968_v36 = vmul.f32 %v2037_v31, %v945_v34 }
 0x1f4   : > { %v981_v37 = vadd.f32 %v2038_v32, %v970_v35 }
 0x1f5   : > { %v979_v38 = vadd.f32 %v2038_v32, %v968_v36  ;;  %v960_v39 = vpop.permute.xlu1 %959 }
 0x1f6   : > { %v950_v40 = vpop.permute.xlu0 %949  ;;  %985 = vst [vmem:[#allocation3 + $0x10] sm:$0xff] %v981_v37  ;;  %v971_v41 = vmul.f32 %v2037_v31, %v960_v39 }
 0x1f7   : > { %983 = vst [vmem:[#allocation3] sm:$0xff] %v979_v38  ;;  %v969_v42 = vmul.f32 %v2037_v31, %v950_v40 }
 0x1f8   : > { %v982_v43 = vadd.f32 %v2038_v32, %v971_v41 }
 0x1f9   : > { %v980_v44 = vadd.f32 %v2038_v32, %v969_v42 }
 0x1fa   : > { %986 = vst [vmem:[#allocation3 + $0x18] sm:$0xff] %v982_v43 }
 0x1fb   : > { %984 = vst [vmem:[#allocation3 + $0x8] sm:$0xff] %v980_v44 }
 0x261   : > { %v2142_v46 = vpop.f32.mrb[0].mxu0 }
 0x262   : > { %v932_v47 = vadd.f32 %v2142_v46, %v2036_v45  ;;  %v926_v48 = vpop.f32.mrb[1].mxu0 }
 0x263   : > { %v927_v49 = vadd.f32 %v2036_v45, %v926_v48 }
 0x264   : > { %936 = vst [vmem:[#allocation2 + $0x8] sm:$0xff] %v932_v47 }
 0x265   : > { %935 = vst [vmem:[#allocation2] sm:$0xff] %v927_v49 }
 0x266 PF: > { %v994_v50 = vld [vmem:[%s3395_s3 + $0x8] sm:$0xff]  ;;  %v993_v52 = vld [vmem:[%s3395_s3] sm:$0xff]  ;;  %v996_v55 = vld [vmem:[%s3395_s3 + $0x18] sm:$0xff]  ;;  %v2899_v57 = vmov 0.0   ;;  %vm1345_vm0 = vcmask 130048   ;;  %s3746_s27 = sld [smem:[#allocation33_spill]] }
 0x267   : > { %v998_v51 = vld [vmem:[%s3395_s3 + $0x28] sm:$0xff]  ;;  %v997_v54 = vld [vmem:[%s3395_s3 + $0x20] sm:$0xff]  ;;  %v1000_v56 = vld [vmem:[%s3395_s3 + $0x38] sm:$0xff]  ;;  %1143 = vmatprep.mubr.f32.mxu0 %v2899_v57  ;;  %1220 = vmatprep.mubr.f32.mxu1 %v2899_v57  ;;  %s3748_s8 = sld [smem:[#allocation34_spill]]  ;;  %vm1586_vm1 = vcmask 261120  }
 0x268   : > { %v2223_v53 = vpack.c.bf16 %v998_v51, %v994_v50  ;;  %v2225_v58 = vpack.c.bf16 %v997_v54, %v993_v52  ;;  %v2255_v59 = vpack.c.bf16 %v1000_v56, %v996_v55  ;;  %v1002_v60 = vld [vmem:[%s3395_s3 + $0x48] sm:$0xff]  ;;  %v995_v62 = vld [vmem:[%s3395_s3 + $0x10] sm:$0xff]  ;;  %v1001_v1 = vld [vmem:[%s3395_s3 + $0x40] sm:$0xff] }
 0x269   : > { %v1006_v61 = vld [vmem:[%s3395_s3 + $0x68] sm:$0xff]  ;;  %v999_v0 = vld [vmem:[%s3395_s3 + $0x30] sm:$0xff]  ;;  %v1005_v2 = vld [vmem:[%s3395_s3 + $0x60] sm:$0xff] }
 0x26a   : > { %2224 = vmatprep.subr.bf16.mxu0 %v2223_v53  ;;  %v2227_v63 = vpack.c.bf16 %v1006_v61, %v1002_v60  ;;  %2256 = vmatprep.subr.bf16.mxu1 %v2255_v59  ;;  %v2257_v3 = vpack.c.bf16 %v999_v0, %v995_v62  ;;  %v2229_v4 = vpack.c.bf16 %v1005_v2, %v1001_v1  ;;  %v1004_v5 = vld [vmem:[%s3395_s3 + $0x58] sm:$0xff]  ;;  %v1010_v7 = vld [vmem:[%s3395_s3 + $0x88] sm:$0xff]  ;;  %v1003_v10 = vld [vmem:[%s3395_s3 + $0x50] sm:$0xff] }
 0x26b   : > { %2226 = vmatpush1.bf16.msra.mxu0 %v2225_v58  ;;  %v1008_v6 = vld [vmem:[%s3395_s3 + $0x78] sm:$0xff]  ;;  %v1014_v9 = vld [vmem:[%s3395_s3 + $0xa8] sm:$0xff]  ;;  %v1007_v11 = vld [vmem:[%s3395_s3 + $0x70] sm:$0xff] }
 0x26c   : > { %2228 = vmatprep.subr.bf16.mxu0 %v2227_v63  ;;  %v2259_v8 = vpack.c.bf16 %v1008_v6, %v1004_v5  ;;  %2258 = vmatpush1.bf16.msra.mxu1 %v2257_v3  ;;  %v2231_v12 = vpack.c.bf16 %v1014_v9, %v1010_v7  ;;  %v2261_v13 = vpack.c.bf16 %v1007_v11, %v1003_v10  ;;  %v1009_v14 = vld [vmem:[%s3395_s3 + $0x80] sm:$0xff]  ;;  %v1012_v16 = vld [vmem:[%s3395_s3 + $0x98] sm:$0xff]  ;;  %v1018_v18 = vld [vmem:[%s3395_s3 + $0xc8] sm:$0xff]  ;;  %s3747_s4 = smov %s3746_s27 }
 0x26d   : > { %v1013_v15 = vld [vmem:[%s3395_s3 + $0xa0] sm:$0xff]  ;;  %v1016_v17 = vld [vmem:[%s3395_s3 + $0xb8] sm:$0xff]  ;;  %v1022_v19 = vld [vmem:[%s3395_s3 + $0xe8] sm:$0xff] }
 0x26e   : > { %2260 = vmatprep.subr.bf16.mxu1 %v2259_v8  ;;  %v2233_v20 = vpack.c.bf16 %v1013_v15, %v1009_v14  ;;  %v2263_v21 = vpack.c.bf16 %v1016_v17, %v1012_v16  ;;  %v1011_v22 = vld [vmem:[%s3395_s3 + $0x90] sm:$0xff]  ;;  %v1017_v24 = vld [vmem:[%s3395_s3 + $0xc0] sm:$0xff]  ;;  %v2235_v25 = vpack.c.bf16 %v1022_v19, %v1018_v18  ;;  %v1020_v27 = vld [vmem:[%s3395_s3 + $0xd8] sm:$0xff] }
 0x26f   : > { %2230 = vmatpush1.bf16.msra.mxu0 %v2229_v4  ;;  %v1015_v23 = vld [vmem:[%s3395_s3 + $0xb0] sm:$0xff]  ;;  %v1021_v26 = vld [vmem:[%s3395_s3 + $0xe0] sm:$0xff]  ;;  %v1024_v28 = vld [vmem:[%s3395_s3 + $0xf8] sm:$0xff] }
 0x270   : > { %2232 = vmatprep.subr.bf16.mxu0 %v2231_v12  ;;  %2262 = vmatpush1.bf16.msra.mxu1 %v2261_v13  ;;  %v2265_v29 = vpack.c.bf16 %v1015_v23, %v1011_v22  ;;  %v1026_v30 = vld [vmem:[%s3395_s3 + $0x108] sm:$0xff]  ;;  %v2267_v32 = vpack.c.bf16 %v1024_v28, %v1020_v27  ;;  %v1019_v33 = vld [vmem:[%s3395_s3 + $0xd0] sm:$0xff]  ;;  %v2237_v35 = vpack.c.bf16 %v1021_v26, %v1017_v24  ;;  %v1028_v36 = vld [vmem:[%s3395_s3 + $0x118] sm:$0xff] }
 0x271   : > { %v1030_v31 = vld [vmem:[%s3395_s3 + $0x128] sm:$0xff]  ;;  %2264 = vmatprep.subr.bf16.mxu1 %v2263_v21  ;;  %v1023_v34 = vld [vmem:[%s3395_s3 + $0xf0] sm:$0xff]  ;;  %v1032_v37 = vld [vmem:[%s3395_s3 + $0x138] sm:$0xff] }
 0x272   : > { %v2239_v38 = vpack.c.bf16 %v1030_v31, %v1026_v30  ;;  %v1025_v39 = vld [vmem:[%s3395_s3 + $0x100] sm:$0xff]  ;;  %v2269_v41 = vpack.c.bf16 %v1023_v34, %v1019_v33  ;;  %v1034_v42 = vld [vmem:[%s3395_s3 + $0x148] sm:$0xff]  ;;  %v2271_v44 = vpack.c.bf16 %v1032_v37, %v1028_v36  ;;  %v1027_v45 = vld [vmem:[%s3395_s3 + $0x110] sm:$0xff] }
 0x273   : > { %2234 = vmatpush1.bf16.msra.mxu0 %v2233_v20  ;;  %v1029_v40 = vld [vmem:[%s3395_s3 + $0x120] sm:$0xff]  ;;  %v1038_v43 = vld [vmem:[%s3395_s3 + $0x168] sm:$0xff]  ;;  %v1031_v46 = vld [vmem:[%s3395_s3 + $0x130] sm:$0xff] }
 0x274   : > { %2236 = vmatprep.subr.bf16.mxu0 %v2235_v25  ;;  %2266 = vmatpush1.bf16.msra.mxu1 %v2265_v29  ;;  %v2241_v47 = vpack.c.bf16 %v1029_v40, %v1025_v39  ;;  %v1036_v48 = vld [vmem:[%s3395_s3 + $0x158] sm:$0xff]  ;;  %v2243_v50 = vpack.c.bf16 %v1038_v43, %v1034_v42  ;;  %v1033_v51 = vld [vmem:[%s3395_s3 + $0x140] sm:$0xff]  ;;  %v2273_v53 = vpack.c.bf16 %v1031_v46, %v1027_v45  ;;  %v1042_v54 = vld [vmem:[%s3395_s3 + $0x188] sm:$0xff] }
 0x275   : > { %2268 = vmatprep.subr.bf16.mxu1 %v2267_v32  ;;  %v1040_v49 = vld [vmem:[%s3395_s3 + $0x178] sm:$0xff]  ;;  %v1037_v52 = vld [vmem:[%s3395_s3 + $0x160] sm:$0xff]  ;;  %v1046_v55 = vld [vmem:[%s3395_s3 + $0x1a8] sm:$0xff] }
 0x276   : > { %v2275_v56 = vpack.c.bf16 %v1040_v49, %v1036_v48  ;;  %v1035_v58 = vld [vmem:[%s3395_s3 + $0x150] sm:$0xff]  ;;  %v2245_v60 = vpack.c.bf16 %v1037_v52, %v1033_v51  ;;  %v1044_v61 = vld [vmem:[%s3395_s3 + $0x198] sm:$0xff]  ;;  %v2247_v63 = vpack.c.bf16 %v1046_v55, %v1042_v54  ;;  %v1041_v0 = vld [vmem:[%s3395_s3 + $0x180] sm:$0xff] }
 0x277   : > { %2238 = vmatpush1.bf16.msra.mxu0 %v2237_v35  ;;  %v1039_v59 = vld [vmem:[%s3395_s3 + $0x170] sm:$0xff]  ;;  %v1048_v62 = vld [vmem:[%s3395_s3 + $0x1b8] sm:$0xff]  ;;  %v1045_v1 = vld [vmem:[%s3395_s3 + $0x1a0] sm:$0xff] }
 0x278   : > { %2240 = vmatprep.subr.bf16.mxu0 %v2239_v38  ;;  %2270 = vmatpush1.bf16.msra.mxu1 %v2269_v41  ;;  %v2277_v2 = vpack.c.bf16 %v1039_v59, %v1035_v58  ;;  %v1050_v3 = vld [vmem:[%s3395_s3 + $0x1c8] sm:$0xff]  ;;  %v2279_v5 = vpack.c.bf16 %v1048_v62, %v1044_v61  ;;  %v1043_v6 = vld [vmem:[%s3395_s3 + $0x190] sm:$0xff]  ;;  %v2249_v8 = vpack.c.bf16 %v1045_v1, %v1041_v0  ;;  %v1052_v9 = vld [vmem:[%s3395_s3 + $0x1d8] sm:$0xff] }
 0x279   : > { %2272 = vmatprep.subr.bf16.mxu1 %v2271_v44  ;;  %v1054_v4 = vld [vmem:[%s3395_s3 + $0x1e8] sm:$0xff]  ;;  %v1047_v7 = vld [vmem:[%s3395_s3 + $0x1b0] sm:$0xff]  ;;  %v1056_v10 = vld [vmem:[%s3395_s3 + $0x1f8] sm:$0xff] }
 0x27a   : > { %v2251_v11 = vpack.c.bf16 %v1054_v4, %v1050_v3  ;;  %v1049_v12 = vld [vmem:[%s3395_s3 + $0x1c0] sm:$0xff]  ;;  %v2281_v14 = vpack.c.bf16 %v1047_v7, %v1043_v6  ;;  %v1233_v15 = vld [vmem:[%s3405_s23] sm:$0xff]  ;;  %v1234_v16 = vld [vmem:[%s3405_s23 + $0x8] sm:$0xff]  ;;  %v2283_v17 = vpack.c.bf16 %v1056_v10, %v1052_v9 }
 0x27b   : > { %2242 = vmatpush1.bf16.msra.mxu0 %v2241_v47  ;;  %v1053_v13 = vld [vmem:[%s3395_s3 + $0x1e0] sm:$0xff]  ;;  %v1051_v18 = vld [vmem:[%s3395_s3 + $0x1d0] sm:$0xff]  ;;  %v2287_v21 = vpack.c.bf16 %v1234_v16, %v1233_v15  ;;  %v1235_v25 = vld [vmem:[%s3405_s23 + $0x10] sm:$0xff] }
 0x27c   : > { %2244 = vmatprep.subr.bf16.mxu0 %v2243_v50  ;;  %2274 = vmatpush1.bf16.msra.mxu1 %v2273_v53  ;;  %v1055_v19 = vld [vmem:[%s3395_s3 + $0x1f0] sm:$0xff]  ;;  %v2253_v20 = vpack.c.bf16 %v1053_v13, %v1049_v12  ;;  %v1236_v26 = vld [vmem:[%s3405_s23 + $0x18] sm:$0xff]  ;;  %v1237_v28 = vld [vmem:[%s3405_s23 + $0x20] sm:$0xff]  ;;  %v1059_v50 = vlaneseq }
 0x27d   : > { %2276 = vmatprep.subr.bf16.mxu1 %v2275_v56  ;;  %v2285_v22 = vpack.c.bf16 %v1055_v19, %v1051_v18  ;;  %v3500_v23 = vld [vmem:[#allocation2] sm:$0xff]  ;;  %v3504_v24 = vld [vmem:[#allocation2 + $0x8] sm:$0xff]  ;;  %v2291_v27 = vpack.c.bf16 %v1236_v26, %v1235_v25  ;;  %v1240_v32 = vld [vmem:[%s3405_s23 + $0x38] sm:$0xff] }
 0x27e   : > { %v1238_v29 = vld [vmem:[%s3405_s23 + $0x28] sm:$0xff]  ;;  %v1239_v31 = vld [vmem:[%s3405_s23 + $0x30] sm:$0xff]  ;;  %v1241_v34 = vld [vmem:[%s3405_s23 + $0x40] sm:$0xff]  ;;  %v3537_v51 = vshrl.u32 %v1059_v50, 7 }
 0x27f   : > { %2246 = vmatpush1.bf16.msra.mxu0 %v2245_v60  ;;  %v2295_v30 = vpack.c.bf16 %v1238_v29, %v1237_v28  ;;  %v2299_v33 = vpack.c.bf16 %v1240_v32, %v1239_v31  ;;  %v1242_v35 = vld [vmem:[%s3405_s23 + $0x48] sm:$0xff]  ;;  %v1243_v37 = vld [vmem:[%s3405_s23 + $0x50] sm:$0xff]  ;;  %v1244_v38 = vld [vmem:[%s3405_s23 + $0x58] sm:$0xff] }
 0x280   : > { %2248 = vmatprep.subr.bf16.mxu0 %v2247_v63  ;;  %2278 = vmatpush1.bf16.msra.mxu1 %v2277_v2  ;;  %v2303_v36 = vpack.c.bf16 %v1242_v35, %v1241_v34  ;;  %v2307_v39 = vpack.c.bf16 %v1244_v38, %v1243_v37  ;;  %v1245_v40 = vld [vmem:[%s3405_s23 + $0x60] sm:$0xff]  ;;  %v1246_v41 = vld [vmem:[%s3405_s23 + $0x68] sm:$0xff]  ;;  %v1247_v43 = vld [vmem:[%s3405_s23 + $0x70] sm:$0xff]  ;;  %v1061_v52 = vsub.s32 0, %v3537_v51  ;;  %v1065_v54 = vsub.s32 1, %v3537_v51 }
 0x281   : > { %2280 = vmatprep.subr.bf16.mxu1 %v2279_v5  ;;  %v2311_v42 = vpack.c.bf16 %v1246_v41, %v1245_v40  ;;  %v1248_v44 = vld [vmem:[%s3405_s23 + $0x78] sm:$0xff]  ;;  %v3531_v48 = vld [vmem:[#allocation3 + $0x10] sm:$0xff]  ;;  %v3534_v49 = vld [vmem:[#allocation3 + $0x18] sm:$0xff]  ;;  %v1073_v55 = vsub.s32 3, %v3537_v51  ;;  %s3745_s23 = sld [smem:[#allocation32_spill]] }
 0x282   : > { %v2315_v45 = vpack.c.bf16 %v1248_v44, %v1247_v43  ;;  %v3525_v46 = vld [vmem:[#allocation3] sm:$0xff]  ;;  %v3528_v47 = vld [vmem:[#allocation3 + $0x8] sm:$0xff]  ;;  %v1448_v18 = vld [vmem:[%s3747_s4 + $0x8] sm:$0xff] }
 0x283   : > { %2250 = vmatpush1.bf16.msra.mxu0 %v2249_v8  ;;  %v3541_v53 = vld [vmem:[%s3403_s26] sm:$0xf]  ;;  %v2039_v34 = vld [vmem:[%s723_s29] ss:$0 sm:$0xff] }
 0x284   : > { %2252 = vmatprep.subr.bf16.mxu0 %v2251_v11  ;;  %2282 = vmatpush1.bf16.msra.mxu1 %v2281_v14  ;;  %v1062_v58 = vrot.slane %v3541_v53, %v1061_v52  ;;  %v1066_v60 = vrot.slane %v3541_v53, %v1065_v54  ;;  %v1074_v62 = vrot.slane %v3541_v53, %v1073_v55  ;;  %v1449_v19 = vld [vmem:[%s3747_s4 + $0x10] sm:$0xff] }
 0x285   : > { %2284 = vmatprep.subr.bf16.mxu1 %v2283_v17  ;;  %v1447_v17 = vld [vmem:[%s3746_s27] sm:$0xff] }
 0x287   : > { %2254 = vmatpush1.bf16.msra.mxu0 %v2253_v20  ;;  %v1341_v13 = vld [vmem:[%s3745_s23] sm:$0xff]  ;;  %v1342_v14 = vld [vmem:[%s3745_s23 + $0x8] sm:$0xff]  ;;  %v1343_v15 = vld [vmem:[%s3745_s23 + $0x10] sm:$0xff] }
 0x288   : > { %2288 = vmatprep.subr.bf16.mxu0 %v2287_v21  ;;  %2286 = vmatpush1.bf16.msra.mxu1 %v2285_v22  ;;  %v1344_v16 = vld [vmem:[%s3745_s23 + $0x18] sm:$0xff] }
 0x289   : > { %v1450_v20 = vld [vmem:[%s3747_s4 + $0x18] sm:$0xff] }
 0x28a   : > { %1144 = vmatmul.mubr.f32.vlgmr.msra.gmra.mrb[0].mxu0 %v3500_v23 }
 0x28b   : > { %1149 = vmatprep.mubr.f32.mxu0 %v2899_v57  ;;  %2290 = vmatpush3.bf16.msra.mxu0 %v2287_v21 }
 0x28c   : > { %1221 = vmatmul.mubr.f32.vlgmr.msra.gmra.mrb[0].mxu1 %v3500_v23  ;;  %2292 = vmatprep.subr.bf16.mxu0 %v2291_v27 }
 0x28d   : > { %1226 = vmatprep.mubr.f32.mxu1 %v2899_v57 }
 0x28e   : > { %1150 = vmatmul.mubr.f32.gmra.mrb[2].mxu0 %v3504_v24 }
 0x28f   : > { %2294 = vmatpush3.bf16.msra.mxu0 %v2291_v27  ;;  %2175 = vmatprep.mubr.f32.mxu0 %v3525_v46 }
 0x290   : > { %1227 = vmatmul.mubr.f32.gmra.mrb[2].mxu1 %v3504_v24  ;;  %2296 = vmatprep.subr.bf16.mxu0 %v2295_v30 }
 0x291   : > { %1422 = vmatprep.mubr.f32.mxu1 %v2899_v57 }
 0x293   : > { %2298 = vmatpush3.bf16.msra.mxu0 %v2295_v30 }
 0x294   : > { %2300 = vmatprep.subr.bf16.mxu0 %v2299_v33 }
 0x297   : > { %2302 = vmatpush3.bf16.msra.mxu0 %v2299_v33 }
 0x298   : > { %2304 = vmatprep.subr.bf16.mxu0 %v2303_v36 }
 0x29b   : > { %2306 = vmatpush3.bf16.msra.mxu0 %v2303_v36 }
 0x29c   : > { %2308 = vmatprep.subr.bf16.mxu0 %v2307_v39 }
 0x29f   : > { %2310 = vmatpush3.bf16.msra.mxu0 %v2307_v39 }
 0x2a0   : > { %2312 = vmatprep.subr.bf16.mxu0 %v2311_v42 }
 0x2a3   : > { %2314 = vmatpush3.bf16.msra.mxu0 %v2311_v42 }
 0x2a4   : > { %2316 = vmatprep.subr.bf16.mxu0 %v2315_v45 }
 0x2a7   : > { %2318 = vmatpush3.bf16.msra.mxu0 %v2315_v45 }
 0x2aa   : > { %2176 = vmatmul.mubr.f32.vlgmr.msra.gmra.mrb[4].mxu0 %v3528_v47 }
 0x2ab   : > { %2178 = vmatprep.mubr.f32.mxu0 %v3531_v48 }
 0x2ae   : > { %2179 = vmatmul.mubr.f32.gmra.mrb[6].mxu0 %v3534_v49 }
 0x35d   : > { %v1145_v56 = vpop.f32.mrb[0].mxu0 }
 0x35e   : > { %v1147_v59 = vpop.f32.mrb[1].mxu0  ;;  %v1146_v1 = vadd.f32 %v1145_v56, %v1062_v58 }
 0x35f   : > { %v3547_v61 = vpop.f32.mrb[0].mxu1  ;;  %v1148_v4 = vadd.f32 %v1147_v59, %v1066_v60 }
 0x360   : > { %v1224_v63 = vpop.f32.mrb[1].mxu1 }
 0x361   : > { %v1151_v0 = vpop.f32.mrb[2].mxu0  ;;  %v1225_v6 = vadd.f32 %v1224_v63, %v1074_v62 }
 0x362   : > { %v1152_v2 = vadd.f32 %v1151_v0, %v1062_v58  ;;  %v1153_v3 = vpop.f32.mrb[3].mxu0 }
 0x363   : > { %v1154_v5 = vadd.f32 %v1153_v3, %v1066_v60  ;;  %v3550_v7 = vpop.f32.mrb[2].mxu1 }
 0x364   : > { %v2321_v8 = vpack.c.bf16 %v1152_v2, %v1146_v1  ;;  %v1230_v9 = vpop.f32.mrb[3].mxu1 }
 0x365   : > { %v2319_v10 = vpack.c.bf16 %v1154_v5, %v1148_v4  ;;  %v1231_v11 = vadd.f32 %v1230_v9, %v1074_v62 }
 0x367   : > { %v2323_v12 = vpack.c.bf16 %v1231_v11, %v1225_v6  ;;  %2320 = vmatprep.subr.bf16.mxu1 %v2319_v10 }
 0x368   : > { %2322 = vmatpush1.bf16.msra.mxu1 %v2321_v8 }
 0x369   : > { %2324 = vmatprep.subr.bf16.mxu1 %v2323_v12 }
 0x36b   : > { %2040 = vmatmul.mubr.msk.f32.vlgmr.msra.gmra.mrb[4].mxu1 %vm1345_vm0, %v1341_v13 }
 0x36c   : > { %2326 = vmatpush3.bf16.msra.mxu1 %v2323_v12  ;;  %1428 = vmatprep.mubr.f32.mxu1 %v2899_v57 }
 0x36f   : > { %2041 = vmatmul.mubr.msk.f32.gmra.mrb[6].mxu1 %vm1345_vm0, %v1342_v14 }
 0x370   : > { %1434 = vmatprep.mubr.f32.mxu1 %v2899_v57 }
 0x373   : > { %2042 = vmatmul.mubr.msk.f32.gmra.mrb[8].mxu1 %vm1345_vm0, %v1343_v15 }
 0x374   : > { %1440 = vmatprep.mubr.f32.mxu1 %v2899_v57 }
 0x377   : > { %2043 = vmatmul.mubr.msk.f32.gmra.mrb[10].mxu1 %vm1345_vm0, %v1344_v16 }
 0x378   : > { %2185 = vmatprep.mubr.msk.f32.mxu1 %vm1345_vm0, %v1447_v17 }
 0x37b   : > { %2186 = vmatmul.mubr.msk.f32.vlgmr.msra.gmra.mrb[12].mxu1 %vm1345_vm0, %v1448_v18 }
 0x37c   : > { %2188 = vmatprep.mubr.msk.f32.mxu1 %vm1345_vm0, %v1449_v19 }
 0x37d   : > { %v2177_v21 = vpop.f32.mrb[4].mxu0 }
 0x37e   : > { %v1322_v22 = vpop.f32.mrb[5].mxu0  ;;  %v1328_v36 = vadd.f32 %v2177_v21, %v2039_v34 }
 0x37f   : > { %2189 = vmatmul.mubr.msk.f32.gmra.mrb[14].mxu1 %vm1345_vm0, %v1450_v20  ;;  %v1323_v38 = vadd.f32 %v2039_v34, %v1322_v22 }
 0x380   : > { %1657 = vmatprep.mubr.f32.mxu1 %v2899_v57 }
 0x381   : > { %v2180_v25 = vpop.f32.mrb[6].mxu0 }
 0x382   : > { %v1332_v26 = vpop.f32.mrb[7].mxu0  ;;  %v1338_v43 = vadd.f32 %v2180_v25, %v2039_v34 }
 0x383   : > { %v1333_v50 = vadd.f32 %v2039_v34, %v1332_v26 }
 0x43e   : > { %v1424_v27 = vpop.f32.mrb[4].mxu1 }
 0x43f   : > { %v3588_v28 = vpop.f32.mrb[5].mxu1 }
 0x442   : > { %v1430_v29 = vpop.f32.mrb[6].mxu1 }
 0x443   : > { %v1432_v30 = vpop.f32.mrb[7].mxu1 }
 0x446   : > { %v1436_v31 = vpop.f32.mrb[8].mxu1 }
 0x447   : > { %v3590_v32 = vpop.f32.mrb[9].mxu1 }
 0x44a   : > { %v1442_v33 = vpop.f32.mrb[10].mxu1 }
 0x44b   : > { %v3594_v35 = vpop.f32.mrb[11].mxu1 }
 0x44e   : > { %v2187_v37 = vpop.f32.mrb[12].mxu1 }
 0x44f   : > { %v1549_v39 = vadd.f32 %v2187_v37, %v1430_v29  ;;  %v1529_v40 = vpop.f32.mrb[13].mxu1 }
 0x450   : > { %v1548_v41 = vadd.f32 %v1529_v40, %v1424_v27 }
 0x451   : > { %v1553_v42 = vadd.f32 %v1549_v39, %v1328_v36 }
 0x452   : > { %v1552_v44 = vadd.f32 %v1548_v41, %v1323_v38  ;;  %v2190_v45 = vpop.f32.mrb[14].mxu1 }
 0x453   : > { %v2049_v52 = vmul.f32 -1.442695, %v1553_v42  ;;  %v1551_v54 = vadd.f32 %v2190_v45, %v1442_v33  ;;  %v1539_v55 = vpop.f32.mrb[15].mxu1 }
 0x454   : > { %v2048_v56 = vmul.f32 -1.442695, %v1552_v44  ;;  %v1725_v58 = vadd.f32 %v1553_v42, %v1552_v44  ;;  %v1550_v59 = vadd.f32 %v1539_v55, %v1436_v31 }
 0x455   : > { %2458 = vpow2.f32 %v2049_v52  ;;  %v1555_v60 = vadd.f32 %v1551_v54, %v1338_v43 }
 0x456   : > { %2460 = vpow2.f32 %v2048_v56  ;;  %v1554_v62 = vadd.f32 %v1550_v59, %v1333_v50 }
 0x457   : > { %v2051_v63 = vmul.f32 -1.442695, %v1555_v60 }
 0x458   : > { %v2050_v0 = vmul.f32 -1.442695, %v1554_v62  ;;  %v1726_v1 = vadd.f32 %v1725_v58, %v1554_v62 }
 0x459   : > { %2462 = vpow2.f32 %v2051_v63  ;;  %v2056_v63 = vld [vmem:[%s747_s24] ss:$0 sm:$0xff]  ;;  %s3749_s24 = scalar_lea.vmem [#allocation16], %s3392_s0 }
 0x45a   : > { %2464 = vpow2.f32 %v2050_v0  ;;  %v1727_v2 = vadd.f32 %v1726_v1, %v1555_v60 }
 0x45c   : > { %v1728_v3 = vrot.slane %v1727_v2, 4 }
 0x45e   : > { %v1729_v4 = vadd.f32 %v1728_v3, %v1727_v2 }
 0x45f   : > { %v2459_v5 = vpop.eup %2458 }
 0x460   : > { %v2461_v6 = vpop.eup %2460  ;;  %v1569_v8 = vadd.f32 1.0, %v2459_v5  ;;  %v1730_v9 = vrot.slane %v1729_v4, 2 }
 0x461   : > { %v1568_v10 = vadd.f32 1.0, %v2461_v6 }
 0x462   : > { %2466 = vrcp.f32 %v1569_v8  ;;  %v1731_v11 = vadd.f32 %v1730_v9, %v1729_v4  ;;  %v2057_v4 = vld [vmem:[%s755_s1] ss:$0 sm:$0xff]  ;;  %s3750_s1 = sld [smem:[#allocation25_spill]] }
 0x463   : > { %v2463_v12 = vpop.eup %2462  ;;  %2468 = vrcp.f32 %v1568_v10 }
 0x464   : > { %v2465_v13 = vpop.eup %2464  ;;  %v1571_v14 = vadd.f32 1.0, %v2463_v12  ;;  %v1732_v15 = vrot.slane %v1731_v11, 1 }
 0x465   : > { %v1570_v16 = vadd.f32 1.0, %v2465_v13 }
 0x466   : > { %2470 = vrcp.f32 %v1571_v14  ;;  %v1733_v17 = vadd.f32 %v1732_v15, %v1731_v11 }
 0x467   : > { %2472 = vrcp.f32 %v1570_v16 }
 0x468   : > { %v1735_v18 = vmul.f32 0.03125, %v1733_v17  ;;  %p2058_p1 = scmp.ne.s32.totalorder %s3750_s1, 9 }
 0x469   : > { %s3751_s27 = sld [smem:[#allocation37_spill]] (!%p2058_p1) }
 0x46a   : > { %v1736_v19 = vsub.f32 %v1552_v44, %v1735_v18  ;;  %v1737_v20 = vsub.f32 %v1553_v42, %v1735_v18  ;;  %v1738_v21 = vsub.f32 %v1554_v62, %v1735_v18  ;;  %v1739_v22 = vsub.f32 %v1555_v60, %v1735_v18 }
 0x46c   : > { %v2467_v25 = vpop.eup %2466  ;;  %v1740_v26 = vmul.f32 %v1736_v19, %v1736_v19  ;;  %v1741_v27 = vmul.f32 %v1737_v20, %v1737_v20  ;;  %v1742_v33 = vmul.f32 %v1738_v21, %v1738_v21  ;;  %v1743_v39 = vmul.f32 %v1739_v22, %v1739_v22 }
 0x46d   : > { %v2469_v29 = vpop.eup %2468  ;;  %v1581_v31 = vmul.f32 %v2467_v25, %v1432_v30 }
 0x46e   : > { %v1744_v34 = vadd.f32 %v1741_v27, %v1740_v26  ;;  %v2327_v36 = vpack.c.bf16 %v2467_v25, %v2469_v29  ;;  %v1580_v37 = vmul.f32 %v2469_v29, %v3588_v28  ;;  %v1584_v28 = vld [vmem:[%s3748_s8] sm:$0xff] }
 0x46f   : > { %s3752_s3 = smov (!%p2058_p1), %s3751_s27 }
 0x470   : > { %v2471_v38 = vpop.eup %2470  ;;  %v1745_v40 = vadd.f32 %v1744_v34, %v1742_v33  ;;  %2328 = vmatprep.subr.bf16.mxu1 %v2327_v36  ;;  %v2329_v41 = vpack.c.bf16 %v1581_v31, %v1580_v37  ;;  %v1069_v31 = vsub.s32 2, %v3537_v51 }
 0x471   : > { %v2473_v43 = vpop.eup %2472  ;;  %v1583_v42 = vmul.f32 %v2471_v38, %v3594_v35 }
 0x472   : > { %v1746_v44 = vadd.f32 %v1745_v40, %v1743_v39  ;;  %2330 = vmatpush1.bf16.msra.mxu1 %v2329_v41  ;;  %v2331_v45 = vpack.c.bf16 %v2471_v38, %v2473_v43  ;;  %v1582_v50 = vmul.f32 %v2473_v43, %v3590_v32  ;;  %v1585_v32 = vld [vmem:[%s3748_s8 + $0x8] sm:$0xff] }
 0x474   : > { %v1747_v52 = vrot.slane %v1746_v44, 4  ;;  %2332 = vmatprep.subr.bf16.mxu1 %v2331_v45  ;;  %v2333_v30 = vpack.c.bf16 %v1583_v42, %v1582_v50 }
 0x476   : > { %v1748_v54 = vadd.f32 %v1747_v52, %v1746_v44  ;;  %2334 = vmatpush1.bf16.msra.mxu1 %v2333_v30 }
 0x478   : > { %v1749_v55 = vrot.slane %v1748_v54, 2 }
 0x479   : > { %2052 = vmatmul.mubr.msk.f32.vlgmr.msra.gmra.mrb[16].mxu1 %vm1586_vm1, %v1584_v28 }
 0x47a   : > { %v1750_v35 = vadd.f32 %v1749_v55, %v1748_v54  ;;  %1663 = vmatprep.mubr.f32.mxu1 %v2899_v57 }
 0x47c   : > { %v1751_v56 = vrot.slane %v1750_v35, 1 }
 0x47d   : > { %2053 = vmatmul.mubr.msk.f32.gmra.mrb[18].mxu1 %vm1586_vm1, %v1585_v32 }
 0x47e   : > { %v1752_v58 = vadd.f32 %v1751_v56, %v1750_v35 }
 0x480   : > { %v1753_v59 = vmul.f32 0.03125, %v1752_v58 }
 0x482   : > { %v1754_v60 = vadd.f32 1e-05, %v1753_v59 }
 0x484   : > { %2474 = vrsqrt.f32 %v1754_v60  ;;  %v2054_v60 = vld [vmem:[%s731_s2] ss:$0 sm:$0xff] }
 0x48e   : > { %v2475_v62 = vpop.eup %2474 }
 0x48f   : > { %v1756_v0 = vmul.f32 %v2475_v62, %v1736_v19  ;;  %v1757_v1 = vmul.f32 %v2475_v62, %v1737_v20  ;;  %v1758_v2 = vmul.f32 %v2475_v62, %v1738_v21  ;;  %v1759_v3 = vmul.f32 %v2475_v62, %v1739_v22 }
 0x491   : > { %v1766_v57 = vmul.f32 %v2056_v63, %v1756_v0  ;;  %v1767_v5 = vmul.f32 %v2056_v63, %v1757_v1  ;;  %v1768_v6 = vmul.f32 %v2056_v63, %v1758_v2  ;;  %v1769_v8 = vmul.f32 %v2056_v63, %v1759_v3  ;;  %v2055_v0 = vld [vmem:[%s3749_s24] ss:$0 sm:$0xff] }
 0x493   : > { %v1776_v9 = vadd.f32 %v2057_v4, %v1766_v57  ;;  %v1777_v10 = vadd.f32 %v2057_v4, %v1767_v5  ;;  %v1778_v11 = vadd.f32 %v2057_v4, %v1768_v6  ;;  %v1779_v12 = vadd.f32 %v2057_v4, %v1769_v8 }
 0x495   : > { %v1780_v13 = vmax.f32 %v1776_v9, 0.0  ;;  %v1781_v14 = vmax.f32 %v1777_v10, 0.0  ;;  %v1782_v15 = vmax.f32 %v1778_v11, 0.0  ;;  %v1783_v16 = vmax.f32 %v1779_v12, 0.0 }
 0x497   : > { %v1788_v17 = vadd.f32 %v1780_v13, %v3525_v46  ;;  %v1789_v18 = vadd.f32 %v1781_v14, %v3528_v47  ;;  %v1790_v19 = vadd.f32 %v1782_v15, %v3531_v48  ;;  %v1791_v20 = vadd.f32 %v1783_v16, %v3534_v49 }
 0x498   : > { %v1070_v46 = vrot.slane %v3541_v53, %v1069_v31 }
 0x499   : > { %1792 = vst [vmem:[#allocation3] sm:$0xff] %v1788_v17  ;;  %1793 = vst [vmem:[#allocation3 + $0x8] sm:$0xff] %v1789_v18 }
 0x49a   : > { %1794 = vst [vmem:[#allocation3 + $0x10] sm:$0xff] %v1790_v19  ;;  %1795 = vst [vmem:[#allocation3 + $0x18] sm:$0xff] %v1791_v20  ;;  %v1223_v48 = vadd.f32 %v3547_v61, %v1070_v46  ;;  %v1229_v36 = vadd.f32 %v3550_v7, %v1070_v46 }
 0x54c   : > { %v1659_v21 = vpop.f32.mrb[16].mxu1 }
 0x54d   : > { %v1661_v22 = vpop.f32.mrb[17].mxu1 }
 0x54e   : > { %v1670_v25 = vadd.f32 1e-06, %v1661_v22 }
 0x550   : > { %2476 = vrcp.f32 %v1670_v25  ;;  %v1665_v26 = vpop.f32.mrb[18].mxu1 }
 0x551   : > { %v1667_v27 = vpop.f32.mrb[19].mxu1 }
 0x552   : > { %v1671_v29 = vadd.f32 1e-06, %v1667_v27 }
 0x554   : > { %2478 = vrcp.f32 %v1671_v29 }
 0x55a   : > { %v2477_v47 = vpop.eup %2476 }
 0x55b   : > { %v1673_v49 = vmul.f32 %v2477_v47, %v1659_v21 }
 0x55d   : > { %v1676_v33 = vadd.f32 %v1673_v49, %v1223_v48 }
 0x55e   : > { %v2479_v34 = vpop.eup %2478 }
 0x55f   : > { %v1675_v37 = vmul.f32 %v2479_v34, %v1665_v26 }
 0x561   : > { %v1677_v38 = vadd.f32 %v1675_v37, %v1229_v36 }
 0x563   : > { %v1680_v39 = vadd.f32 %v1677_v38, %v1676_v33 }
 0x565   : > { %v1681_v40 = vrot.slane %v1680_v39, 4 }
 0x567   : > { %v1682_v41 = vadd.f32 %v1681_v40, %v1680_v39 }
 0x569   : > { %v1683_v43 = vrot.slane %v1682_v41, 2 }
 0x56b   : > { %v1684_v42 = vadd.f32 %v1683_v43, %v1682_v41 }
 0x56d   : > { %v1685_v44 = vrot.slane %v1684_v42, 1 }
 0x56f   : > { %v1686_v51 = vadd.f32 %v1685_v44, %v1684_v42 }
 0x571   : > { %v1688_v45 = vmul.f32 0.0625, %v1686_v51 }
 0x573   : > { %v1689_v53 = vsub.f32 %v1676_v33, %v1688_v45  ;;  %v1690_v50 = vsub.f32 %v1677_v38, %v1688_v45 }
 0x575   : > { %v1691_v52 = vmul.f32 %v1689_v53, %v1689_v53  ;;  %v1692_v61 = vmul.f32 %v1690_v50, %v1690_v50 }
 0x577   : > { %v1693_v30 = vadd.f32 %v1692_v61, %v1691_v52 }
 0x579   : > { %v1694_v54 = vrot.slane %v1693_v30, 4 }
 0x57b   : > { %v1695_v28 = vadd.f32 %v1694_v54, %v1693_v30 }
 0x57d   : > { %v1696_v7 = vrot.slane %v1695_v28, 2 }
 0x57f   : > { %v1697_v55 = vadd.f32 %v1696_v7, %v1695_v28 }
 0x581   : > { %v1698_v35 = vrot.slane %v1697_v55, 1 }
 0x583   : > { %v1699_v32 = vadd.f32 %v1698_v35, %v1697_v55 }
 0x585   : > { %v1700_v56 = vmul.f32 0.0625, %v1699_v32 }
 0x587   : > { %v1701_v58 = vadd.f32 1e-05, %v1700_v56 }
 0x589   : > { %2480 = vrsqrt.f32 %v1701_v58 }
 0x593   : > { %v2481_v59 = vpop.eup %2480 }
 0x594   : > { %v1703_v62 = vmul.f32 %v2481_v59, %v1689_v53  ;;  %v1704_v63 = vmul.f32 %v2481_v59, %v1690_v50 }
 0x596   : > { %v1711_v1 = vmul.f32 %v2054_v60, %v1703_v62  ;;  %v1712_v2 = vmul.f32 %v2054_v60, %v1704_v63 }
 0x598   : > { %v1719_v3 = vadd.f32 %v2055_v0, %v1711_v1  ;;  %v1720_v4 = vadd.f32 %v2055_v0, %v1712_v2  ;;  %1799 = sbr.rel (%p2058_p1) target bundleno = 1448 (0x5a8), region = 144 }
 0x59a   : > { %v1721_v57 = vmax.f32 %v1719_v3, 0.0  ;;  %v1722_v5 = vmax.f32 %v1720_v4, 0.0 }
 0x59c   : > { %v1784_v6 = vadd.f32 %v1721_v57, %v3500_v23  ;;  %v1785_v8 = vadd.f32 %v1722_v5, %v3504_v24 }
 0x59e   : > { %1786 = vst [vmem:[#allocation2] sm:$0xff] %v1784_v6  ;;  %1787 = vst [vmem:[#allocation2 + $0x8] sm:$0xff] %v1785_v8 }
 0x5a5   : > { %v1800_v9 = vld [vmem:[#allocation2] sm:$0xff]  ;;  %v1801_v10 = vld [vmem:[#allocation2 + $0x8] sm:$0xff] }
 0x5a6   : > { %1802 = vst [vmem:[%s3751_s27] sm:$0xff] %v1800_v9 }
 0x5a7   : > { %1803 = vst [vmem:[%s3752_s3 + $0x8] sm:$0xff] %v1801_v10 }
 0x5a8 PF: > { %s3753_s27 = sld [smem:[#allocation26_spill]]  ;;  %s3754_s24 = sld [smem:[#allocation23_spill]] }
 0x5a9   : > { %s3755_s25 = sld [smem:[#allocation24_spill]]  ;;  %s3756_s26 = sld [smem:[#allocation27_spill]] }
 0x5ae   : > { %p27_p8 = scmp.ge.s32.totalorder %s3753_s27, 12  }
 0x5b0   :  { %29 = sbr.rel (!%p27_p8) target bundleno = 13 (0xd), region = 224 }
 0x5b7   :  { %1815 = vsyncpa [#allocation5], 1 }
 0x5b8   :  { %1817 = vsyncpa [#allocation5 + $0x1], 1 }
 0x5b9   :  { %1818 = vsyncpa [#allocation7], 1 }
 0x5ba   :  { %1819 = vsyncpa [#allocation10], 1 }

</bundles_post_ra>
